<compile_context>
chip_gen: v7x
topology: tpu7x:2x2x1
jax: 0.10.0
libtpu: 0.0.40
codegen_flags: <defaults>
</compile_context>

<pallas_src>
import functools

import numpy as np

import jax
import jax.numpy as jnp
from jax.experimental import pallas as pl
from jax.experimental.pallas import tpu as pltpu


_VMEM = pltpu.MemorySpace.VMEM


def _vmem_specs(n):
    return [pl.BlockSpec(memory_space=_VMEM) for _ in range(n)]


# ---------------------------------------------------------------------------
# constant 0/1 selection tables (built once per spatial size, cached)
# ---------------------------------------------------------------------------
@functools.lru_cache(maxsize=None)
def _conv_tap_matrices(H, W):
    """(9, HW, HW): column i of tap k selects the zero-padded-window input
    pixel that a 3x3 'same' conv reads for output pixel i (all-zero column at
    the border -> the boundary mask is baked in)."""
    HW = H * W
    i = np.arange(HW)
    h, w = i // W, i % W
    mats = []
    for dy in range(3):
        for dx in range(3):
            sy, sx = dy - 1, dx - 1
            src_h, src_w = h + sy, w + sx
            valid = (src_h >= 0) & (src_h < H) & (src_w >= 0) & (src_w < W)
            t = np.zeros((HW, HW), np.float32)
            t[(src_h * W + src_w)[valid], i[valid]] = 1.0
            mats.append(t)
    return jnp.asarray(np.stack(mats))


@functools.lru_cache(maxsize=None)
def _pool_gather_matrices(H, W):
    """(4, HW, HW/4): gather matrix k picks the k-th element of each 2x2
    pooling window."""
    H2, W2 = H // 2, W // 2
    HW = H * W
    j = np.arange(H2 * W2)
    base = (2 * (j // W2)) * W + 2 * (j % W2)
    mats = []
    for off in (0, 1, W, W + 1):
        g = np.zeros((HW, H2 * W2), np.float32)
        g[base + off, j] = 1.0
        mats.append(g)
    return jnp.asarray(np.stack(mats))


@functools.lru_cache(maxsize=None)
def _upsample_scatter_matrices(H, W):
    """(4, HW, 4*HW): scatter matrix (dy,dx) places input pixel (h,w) at
    output pixel (2h+dy, 2w+dx) of the 2x upsampled map."""
    OW = 2 * W
    HW = H * W
    i = np.arange(HW)
    h, w = i // W, i % W
    mats = []
    for dy in range(2):
        for dx in range(2):
            s = np.zeros((HW, 4 * HW), np.float32)
            s[i, (2 * h + dy) * OW + (2 * w + dx)] = 1.0
            mats.append(s)
    return jnp.asarray(np.stack(mats))


# ---------------------------------------------------------------------------
# kernels
# ---------------------------------------------------------------------------
def _conv3x3_bn_lrelu_body(x_ref, w_ref, t_ref, scale_ref, shift_ref):
    """3x3 'same' conv + folded BatchNorm + LeakyReLU(0.1) on (C_in, HW).

    x_ref:     (C_in, HW)       activation, channel-major / lane-dense
    w_ref:     (9, C_out, C_in) per-tap weights
    t_ref:     (9, HW, HW)      per-tap 0/1 shift+boundary matrices
    scale_ref: (C_out, 1)       folded BN scale
    shift_ref: (C_out, 1)       folded BN shift
    """
    x = x_ref[...]
    c_out, c_in = w_ref.shape[1], w_ref.shape[2]
    acc = jnp.zeros((c_out, x.shape[-1]), jnp.float32)
    for k in range(9):
        # in-kernel im2col for tap k: masked window gather done on the MXU.
        patch = jnp.dot(x, t_ref[k], preferred_element_type=jnp.float32)
        if c_in == 1:
            acc = acc + w_ref[k] * patch          # (C_out,1)*(1,HW) VPU outer product
        else:
            acc = acc + jnp.dot(w_ref[k], patch,
                                preferred_element_type=jnp.float32)
    y = acc * scale_ref[...] + shift_ref[...]     # folded BatchNorm (inference)
    return jnp.maximum(y, 0.1 * y)                # LeakyReLU(0.1)


def _conv3x3_kernel(x_ref, w_ref, t_ref, scale_ref, shift_ref, o_ref):
    y = _conv3x3_bn_lrelu_body(x_ref, w_ref, t_ref, scale_ref, shift_ref)
    o_ref[...] = y.astype(o_ref.dtype)


def _conv3x3_outconv_kernel(x_ref, w_ref, t_ref, scale_ref, shift_ref,
                            wo_ref, bo_ref, o_ref, *, vmin, vmax):
    # Last DoubleConv conv with the OutConv 1x1 head (+ tanh clamp + *1000)
    # fused into its epilogue -> no intermediate HBM round trip.
    y = _conv3x3_bn_lrelu_body(x_ref, w_ref, t_ref, scale_ref, shift_ref)
    z = jnp.dot(wo_ref[...], y, preferred_element_type=jnp.float32) + bo_ref[...]
    if vmin is not None and vmax is not None:
        z = 0.5 * ((vmax - vmin) * jnp.tanh(z) + (vmax + vmin))
    o_ref[...] = (z * 1000.0).astype(o_ref.dtype)


def _maxpool2x2_kernel(x_ref, g_ref, o_ref):
    x = x_ref[...]
    m = jnp.dot(x, g_ref[0], preferred_element_type=jnp.float32)
    for k in range(1, 4):
        m = jnp.maximum(m, jnp.dot(x, g_ref[k],
                                   preferred_element_type=jnp.float32))
    o_ref[...] = m.astype(o_ref.dtype)


def _conv_transpose2x2_kernel(x_ref, w_ref, b_ref, s_ref, o_ref):
    # x: (C_in, HW); w: (4, C_out, C_in); b: (C_out, 1); s: (4, HW, 4*HW)
    x = x_ref[...]
    acc = jnp.zeros(o_ref.shape, jnp.float32)
    for k in range(4):
        y = jnp.dot(w_ref[k], x, preferred_element_type=jnp.float32)
        acc = acc + jnp.dot(y, s_ref[k], preferred_element_type=jnp.float32)
    o_ref[...] = (acc + b_ref[...]).astype(o_ref.dtype)


# ---------------------------------------------------------------------------
# pallas_call wrappers (whole-array, single-step, everything in VMEM)
# ---------------------------------------------------------------------------
def conv3x3_bn_lrelu(x, w, scale, shift, H, W):
    """x: (C_in, H*W); w: (C_out, C_in, 3, 3); scale/shift: (C_out,)."""
    c_out, c_in = w.shape[0], w.shape[1]
    w_taps = jnp.transpose(w.reshape(c_out, c_in, 9), (2, 0, 1))   # (9, C_out, C_in)
    return pl.pallas_call(
        _conv3x3_kernel,
        out_shape=jax.ShapeDtypeStruct((c_out, H * W), jnp.float32),
        in_specs=_vmem_specs(5),
        out_specs=pl.BlockSpec(memory_space=_VMEM),
    )(x, w_taps, _conv_tap_matrices(H, W),
      scale.reshape(c_out, 1), shift.reshape(c_out, 1))


def conv3x3_bn_lrelu_outconv(x, w, scale, shift, w_head, b_head, H, W, vmin, vmax):
    """Final DoubleConv conv with the fused OutConv / tanh / *1000 head."""
    c_out, c_in = w.shape[0], w.shape[1]
    n_cls = w_head.shape[0]
    w_taps = jnp.transpose(w.reshape(c_out, c_in, 9), (2, 0, 1))
    kernel = functools.partial(_conv3x3_outconv_kernel, vmin=vmin, vmax=vmax)
    return pl.pallas_call(
        kernel,
        out_shape=jax.ShapeDtypeStruct((n_cls, H * W), jnp.float32),
        in_specs=_vmem_specs(7),
        out_specs=pl.BlockSpec(memory_space=_VMEM),
    )(x, w_taps, _conv_tap_matrices(H, W),
      scale.reshape(c_out, 1), shift.reshape(c_out, 1),
      w_head.reshape(n_cls, c_out), b_head.reshape(n_cls, 1))


def maxpool2x2(x, H, W):
    c = x.shape[0]
    return pl.pallas_call(
        _maxpool2x2_kernel,
        out_shape=jax.ShapeDtypeStruct((c, (H // 2) * (W // 2)), jnp.float32),
        in_specs=_vmem_specs(2),
        out_specs=pl.BlockSpec(memory_space=_VMEM),
    )(x, _pool_gather_matrices(H, W))


def conv_transpose2x2(x, wt, bias, H, W):
    """x: (C_in, H*W); wt: (C_in, C_out, 2, 2) (PyTorch layout); bias: (C_out,)."""
    c_in, c_out = wt.shape[0], wt.shape[1]
    w_taps = jnp.transpose(wt.reshape(c_in, c_out, 4), (2, 1, 0))   # (4, C_out, C_in)
    return pl.pallas_call(
        _conv_transpose2x2_kernel,
        out_shape=jax.ShapeDtypeStruct((c_out, 4 * H * W), jnp.float32),
        in_specs=_vmem_specs(4),
        out_specs=pl.BlockSpec(memory_space=_VMEM),
    )(x, w_taps, bias.reshape(c_out, 1), _upsample_scatter_matrices(H, W))


# ---------------------------------------------------------------------------
# UNet forward (base_channel=16, bilinear=False, in_channels=out_channels=1)
# ---------------------------------------------------------------------------
def _double_conv(x, p, H, W):
    y = conv3x3_bn_lrelu(x, p["w1"], p["s1"], p["b1"], H, W)
    return conv3x3_bn_lrelu(y, p["w2"], p["s2"], p["b2"], H, W)


def unet_forward(params, latent, vmin=None, vmax=None):
    _, _, H0, W0 = latent.shape
    H1, W1 = H0 // 2, W0 // 2
    H2, W2 = H1 // 2, W1 // 2
    p = params

    x = latent.reshape(1, H0 * W0)                                   # (1, HW)
    x1 = _double_conv(x, p["inc"], H0, W0)                           # (16, 256)
    x2 = _double_conv(maxpool2x2(x1, H0, W0), p["down1"], H1, W1)    # (32, 64)
    x3 = _double_conv(maxpool2x2(x2, H1, W1), p["down2"], H2, W2)    # (64, 16)

    # up1: ConvTranspose2d(64->32, 2, 2), concat skip x2, DoubleConv(64->32)
    u1 = conv_transpose2x2(x3, p["up1_t"]["w"], p["up1_t"]["b"], H2, W2)
    # TODO(synk): F.pad re-alignment skipped (spatial sizes match for even H/W).
    y1 = _double_conv(jnp.concatenate([x2, u1], axis=0), p["up1_c"], H1, W1)

    # up2: ConvTranspose2d(32->16, 2, 2), concat skip x1, DoubleConv(32->16)
    u2 = conv_transpose2x2(y1, p["up2_t"]["w"], p["up2_t"]["b"], H1, W1)
    c2 = jnp.concatenate([x1, u2], axis=0)
    y2 = conv3x3_bn_lrelu(c2, p["up2_c"]["w1"], p["up2_c"]["s1"],
                          p["up2_c"]["b1"], H0, W0)
    out = conv3x3_bn_lrelu_outconv(
        y2, p["up2_c"]["w2"], p["up2_c"]["s2"], p["up2_c"]["b2"],
        p["outc"]["w"], p["outc"]["b"], H0, W0, vmin, vmax)          # (1, 256)

    return out.reshape(H0, W0)     # torch.squeeze; tanh-clamp and *1000 in-kernel


# ---------------------------------------------------------------------------
# deterministic parameter construction (matches PyTorch module shapes)
# ---------------------------------------------------------------------------
def _init_params(key, base=16):
    keys = iter(jax.random.split(key, 80))

    def conv_w(o, c):
        b = (1.0 / (c * 9)) ** 0.5
        return jax.random.uniform(next(keys), (o, c, 3, 3), jnp.float32, -b, b)

    def bn_fold(c):
        gamma = jax.random.uniform(next(keys), (c,), jnp.float32, 0.5, 1.5)
        beta = jax.random.uniform(next(keys), (c,), jnp.float32, -0.5, 0.5)
        mean = jax.random.uniform(next(keys), (c,), jnp.float32, -0.2, 0.2)
        var = jax.random.uniform(next(keys), (c,), jnp.float32, 0.5, 1.5)
        scale = gamma / jnp.sqrt(var + 1e-5)
        return scale, beta - mean * scale

    def dconv(cin, cout):
        w1 = conv_w(cout, cin)
        s1, b1 = bn_fold(cout)
        w2 = conv_w(cout, cout)
        s2, b2 = bn_fold(cout)
        return dict(w1=w1, s1=s1, b1=b1, w2=w2, s2=s2, b2=b2)

    def conv_t(cin, cout):
        b = (1.0 / (cin * 4)) ** 0.5
        return dict(w=jax.random.uniform(next(keys), (cin, cout, 2, 2),
                                         jnp.float32, -b, b),
                    b=jax.random.uniform(next(keys), (cout,), jnp.float32, -b, b))

    return dict(
        inc=dconv(1, base),                  # DoubleConv(1, 16)
        down1=dconv(base, 2 * base),         # Down(16, 32)
        down2=dconv(2 * base, 4 * base),     # Down(32, 64)  (factor=1)
        up1_t=conv_t(4 * base, 2 * base),    # ConvTranspose2d(64, 32, 2, 2)
        up1_c=dconv(4 * base, 2 * base),     # DoubleConv(64, 32)
        up2_t=conv_t(2 * base, base),        # ConvTranspose2d(32, 16, 2, 2)
        up2_c=dconv(2 * base, base),         # DoubleConv(32, 16)
        outc=dict(
            w=jax.random.uniform(next(keys), (1, base, 1, 1), jnp.float32,
                                 -0.25, 0.25),
            b=jax.random.uniform(next(keys), (1,), jnp.float32, -0.25, 0.25)),
    )


# ---------------------------------------------------------------------------
# pure-JAX reference forward (independent formulation, for correctness check)
# ---------------------------------------------------------------------------
def _ref_conv3x3(x, w):
    C, H, W = x.shape
    xp = jnp.pad(x, ((0, 0), (1, 1), (1, 1)))
    out = jnp.zeros((w.shape[0], H, W), jnp.float32)
    for dy in range(3):
        for dx in range(3):
            out = out + jnp.einsum('oc,chw->ohw', w[:, :, dy, dx],
                                   xp[:, dy:dy + H, dx:dx + W])
    return out


def _ref_bn_lrelu(x, scale, shift):
    y = x * scale[:, None, None] + shift[:, None, None]
    return jnp.maximum(y, 0.1 * y)


def _ref_double_conv(x, p):
    y = _ref_bn_lrelu(_ref_conv3x3(x, p["w1"]), p["s1"], p["b1"])
    return _ref_bn_lrelu(_ref_conv3x3(y, p["w2"]), p["s2"], p["b2"])


def _ref_maxpool(x):
    C, H, W = x.shape
    return x.reshape(C, H // 2, 2, W // 2, 2).max(axis=(2, 4))


def _ref_conv_transpose(x, wt, b):
    C_in, H, W = x.shape
    C_out = wt.shape[1]
    out = jnp.zeros((C_out, 2 * H, 2 * W), jnp.float32)
    for dy in range(2):
        for dx in range(2):
            out = out.at[:, dy::2, dx::2].add(
                jnp.einsum('co,chw->ohw', wt[:, :, dy, dx], x))
    return out + b[:, None, None]


def _ref_forward(params, latent, vmin=None, vmax=None):
    p = params
    x = latent[0]                                        # (1, H, W)
    x1 = _ref_double_conv(x, p["inc"])
    x2 = _ref_double_conv(_ref_maxpool(x1), p["down1"])
    x3 = _ref_double_conv(_ref_maxpool(x2), p["down2"])
    u1 = _ref_conv_transpose(x3, p["up1_t"]["w"], p["up1_t"]["b"])
    y1 = _ref_double_conv(jnp.concatenate([x2, u1], axis=0), p["up1_c"])
    u2 = _ref_conv_transpose(y1, p["up2_t"]["w"], p["up2_t"]["b"])
    y2 = _ref_double_conv(jnp.concatenate([x1, u2], axis=0), p["up2_c"])
    z = jnp.einsum('oc,chw->ohw', p["outc"]["w"][:, :, 0, 0], y2) \
        + p["outc"]["b"][:, None, None]
    z = z[0]
    if vmin is not None and vmax is not None:
        z = 0.5 * ((vmax - vmin) * jnp.tanh(z) + (vmax + vmin))
    return z * 1000.0


if __name__ == "__main__":
    key = jax.random.PRNGKey(0)
    k_lat, k_par = jax.random.split(key)

    H0 = W0 = 16                     # init_v shape (h0, w0)
    vmin, vmax = 1.5, 5.5            # exercise the tanh clamp branch

    # torch.rand(1, 1, h0, w0) analogue (deterministic).
    latent = jax.random.uniform(k_lat, (1, 1, H0, W0), dtype=jnp.float32)
    params = _init_params(k_par)

    out = unet_forward(params, latent, vmin=vmin, vmax=vmax)
    out = jax.block_until_ready(out)
    assert out.shape == (H0, W0), out.shape
    assert bool(jnp.all(jnp.isfinite(out)))

    ref = _ref_forward(params, latent, vmin=vmin, vmax=vmax)
    assert bool(jnp.allclose(out, ref, rtol=2e-2, atol=2.0)), \
        float(jnp.max(jnp.abs(out - ref)))

    print("KERNEL_OK")
</pallas_src>

<mosaic_0001>
module attributes {stable_mosaic.version = 11 : i64} {
  func.func @_conv3x3_kernel(%arg0: memref<1x256xf32, #tpu.memory_space<vmem>>, %arg1: memref<9x16x1xf32, #tpu.memory_space<vmem>>, %arg2: memref<9x256x256xf32, #tpu.memory_space<vmem>>, %arg3: memref<16x1xf32, #tpu.memory_space<vmem>>, %arg4: memref<16x1xf32, #tpu.memory_space<vmem>>, %arg5: memref<16x256xf32, #tpu.memory_space<vmem>>) attributes {dimension_semantics = [], scalar_prefetch = 0 : i64, scratch_operands = 0 : i64, tpu.core_type = #tpu.core_type<tc>} {
    %c0 = arith.constant 0 : index
    %c0_0 = arith.constant 0 : index
    %0 = vector.load %arg0[%c0, %c0_0] : memref<1x256xf32, #tpu.memory_space<vmem>>, vector<1x256xf32>
    %cst = arith.constant 0.000000e+00 : f32
    %1 = vector.broadcast %cst : f32 to vector<16x256xf32>
    %c0_1 = arith.constant 0 : index
    %c0_2 = arith.constant 0 : index
    %c0_3 = arith.constant 0 : index
    %2 = vector.load %arg2[%c0_1, %c0_2, %c0_3] : memref<9x256x256xf32, #tpu.memory_space<vmem>>, vector<1x256x256xf32>
    %3 = vector.shape_cast %2 : vector<1x256x256xf32> to vector<256x256xf32>
    %cst_4 = arith.constant dense<0.000000e+00> : vector<1x256xf32>
    %4 = tpu.matmul %0, %3, %cst_4 {dimension_numbers = #tpu.dot_dimension_numbers<[1], [0], [0], [1], [0, 0, 1, 1], [], []>} : vector<1x256xf32>, vector<256x256xf32>, vector<1x256xf32> -> vector<1x256xf32>
    %c0_5 = arith.constant 0 : index
    %c0_6 = arith.constant 0 : index
    %c0_7 = arith.constant 0 : index
    %5 = vector.load %arg1[%c0_5, %c0_6, %c0_7] : memref<9x16x1xf32, #tpu.memory_space<vmem>>, vector<1x16x1xf32>
    %6 = vector.shape_cast %5 : vector<1x16x1xf32> to vector<16x1xf32>
    %7 = vector.broadcast %6 : vector<16x1xf32> to vector<16x256xf32>
    %8 = vector.broadcast %4 : vector<1x256xf32> to vector<16x256xf32>
    %9 = arith.mulf %7, %8 : vector<16x256xf32>
    %10 = arith.addf %1, %9 : vector<16x256xf32>
    %c1 = arith.constant 1 : index
    %c0_8 = arith.constant 0 : index
    %c0_9 = arith.constant 0 : index
    %11 = vector.load %arg2[%c1, %c0_8, %c0_9] : memref<9x256x256xf32, #tpu.memory_space<vmem>>, vector<1x256x256xf32>
    %12 = vector.shape_cast %11 : vector<1x256x256xf32> to vector<256x256xf32>
    %cst_10 = arith.constant dense<0.000000e+00> : vector<1x256xf32>
    %13 = tpu.matmul %0, %12, %cst_10 {dimension_numbers = #tpu.dot_dimension_numbers<[1], [0], [0], [1], [0, 0, 1, 1], [], []>} : vector<1x256xf32>, vector<256x256xf32>, vector<1x256xf32> -> vector<1x256xf32>
    %c1_11 = arith.constant 1 : index
    %c0_12 = arith.constant 0 : index
    %c0_13 = arith.constant 0 : index
    %14 = vector.load %arg1[%c1_11, %c0_12, %c0_13] : memref<9x16x1xf32, #tpu.memory_space<vmem>>, vector<1x16x1xf32>
    %15 = vector.shape_cast %14 : vector<1x16x1xf32> to vector<16x1xf32>
    %16 = vector.broadcast %15 : vector<16x1xf32> to vector<16x256xf32>
    %17 = vector.broadcast %13 : vector<1x256xf32> to vector<16x256xf32>
    %18 = arith.mulf %16, %17 : vector<16x256xf32>
    %19 = arith.addf %10, %18 : vector<16x256xf32>
    %c2 = arith.constant 2 : index
    %c0_14 = arith.constant 0 : index
    %c0_15 = arith.constant 0 : index
    %20 = vector.load %arg2[%c2, %c0_14, %c0_15] : memref<9x256x256xf32, #tpu.memory_space<vmem>>, vector<1x256x256xf32>
    %21 = vector.shape_cast %20 : vector<1x256x256xf32> to vector<256x256xf32>
    %cst_16 = arith.constant dense<0.000000e+00> : vector<1x256xf32>
    %22 = tpu.matmul %0, %21, %cst_16 {dimension_numbers = #tpu.dot_dimension_numbers<[1], [0], [0], [1], [0, 0, 1, 1], [], []>} : vector<1x256xf32>, vector<256x256xf32>, vector<1x256xf32> -> vector<1x256xf32>
    %c2_17 = arith.constant 2 : index
    %c0_18 = arith.constant 0 : index
    %c0_19 = arith.constant 0 : index
    %23 = vector.load %arg1[%c2_17, %c0_18, %c0_19] : memref<9x16x1xf32, #tpu.memory_space<vmem>>, vector<1x16x1xf32>
    %24 = vector.shape_cast %23 : vector<1x16x1xf32> to vector<16x1xf32>
    %25 = vector.broadcast %24 : vector<16x1xf32> to vector<16x256xf32>
    %26 = vector.broadcast %22 : vector<1x256xf32> to vector<16x256xf32>
    %27 = arith.mulf %25, %26 : vector<16x256xf32>
    %28 = arith.addf %19, %27 : vector<16x256xf32>
    %c3 = arith.constant 3 : index
    %c0_20 = arith.constant 0 : index
    %c0_21 = arith.constant 0 : index
    %29 = vector.load %arg2[%c3, %c0_20, %c0_21] : memref<9x256x256xf32, #tpu.memory_space<vmem>>, vector<1x256x256xf32>
    %30 = vector.shape_cast %29 : vector<1x256x256xf32> to vector<256x256xf32>
    %cst_22 = arith.constant dense<0.000000e+00> : vector<1x256xf32>
    %31 = tpu.matmul %0, %30, %cst_22 {dimension_numbers = #tpu.dot_dimension_numbers<[1], [0], [0], [1], [0, 0, 1, 1], [], []>} : vector<1x256xf32>, vector<256x256xf32>, vector<1x256xf32> -> vector<1x256xf32>
    %c3_23 = arith.constant 3 : index
    %c0_24 = arith.constant 0 : index
    %c0_25 = arith.constant 0 : index
    %32 = vector.load %arg1[%c3_23, %c0_24, %c0_25] : memref<9x16x1xf32, #tpu.memory_space<vmem>>, vector<1x16x1xf32>
    %33 = vector.shape_cast %32 : vector<1x16x1xf32> to vector<16x1xf32>
    %34 = vector.broadcast %33 : vector<16x1xf32> to vector<16x256xf32>
    %35 = vector.broadcast %31 : vector<1x256xf32> to vector<16x256xf32>
    %36 = arith.mulf %34, %35 : vector<16x256xf32>
    %37 = arith.addf %28, %36 : vector<16x256xf32>
    %c4 = arith.constant 4 : index
    %c0_26 = arith.constant 0 : index
    %c0_27 = arith.constant 0 : index
    %38 = vector.load %arg2[%c4, %c0_26, %c0_27] : memref<9x256x256xf32, #tpu.memory_space<vmem>>, vector<1x256x256xf32>
    %39 = vector.shape_cast %38 : vector<1x256x256xf32> to vector<256x256xf32>
    %cst_28 = arith.constant dense<0.000000e+00> : vector<1x256xf32>
    %40 = tpu.matmul %0, %39, %cst_28 {dimension_numbers = #tpu.dot_dimension_numbers<[1], [0], [0], [1], [0, 0, 1, 1], [], []>} : vector<1x256xf32>, vector<256x256xf32>, vector<1x256xf32> -> vector<1x256xf32>
    %c4_29 = arith.constant 4 : index
    %c0_30 = arith.constant 0 : index
    %c0_31 = arith.constant 0 : index
    %41 = vector.load %arg1[%c4_29, %c0_30, %c0_31] : memref<9x16x1xf32, #tpu.memory_space<vmem>>, vector<1x16x1xf32>
    %42 = vector.shape_cast %41 : vector<1x16x1xf32> to vector<16x1xf32>
    %43 = vector.broadcast %42 : vector<16x1xf32> to vector<16x256xf32>
    %44 = vector.broadcast %40 : vector<1x256xf32> to vector<16x256xf32>
    %45 = arith.mulf %43, %44 : vector<16x256xf32>
    %46 = arith.addf %37, %45 : vector<16x256xf32>
    %c5 = arith.constant 5 : index
    %c0_32 = arith.constant 0 : index
    %c0_33 = arith.constant 0 : index
    %47 = vector.load %arg2[%c5, %c0_32, %c0_33] : memref<9x256x256xf32, #tpu.memory_space<vmem>>, vector<1x256x256xf32>
    %48 = vector.shape_cast %47 : vector<1x256x256xf32> to vector<256x256xf32>
    %cst_34 = arith.constant dense<0.000000e+00> : vector<1x256xf32>
    %49 = tpu.matmul %0, %48, %cst_34 {dimension_numbers = #tpu.dot_dimension_numbers<[1], [0], [0], [1], [0, 0, 1, 1], [], []>} : vector<1x256xf32>, vector<256x256xf32>, vector<1x256xf32> -> vector<1x256xf32>
    %c5_35 = arith.constant 5 : index
    %c0_36 = arith.constant 0 : index
    %c0_37 = arith.constant 0 : index
    %50 = vector.load %arg1[%c5_35, %c0_36, %c0_37] : memref<9x16x1xf32, #tpu.memory_space<vmem>>, vector<1x16x1xf32>
    %51 = vector.shape_cast %50 : vector<1x16x1xf32> to vector<16x1xf32>
    %52 = vector.broadcast %51 : vector<16x1xf32> to vector<16x256xf32>
    %53 = vector.broadcast %49 : vector<1x256xf32> to vector<16x256xf32>
    %54 = arith.mulf %52, %53 : vector<16x256xf32>
    %55 = arith.addf %46, %54 : vector<16x256xf32>
    %c6 = arith.constant 6 : index
    %c0_38 = arith.constant 0 : index
    %c0_39 = arith.constant 0 : index
    %56 = vector.load %arg2[%c6, %c0_38, %c0_39] : memref<9x256x256xf32, #tpu.memory_space<vmem>>, vector<1x256x256xf32>
    %57 = vector.shape_cast %56 : vector<1x256x256xf32> to vector<256x256xf32>
    %cst_40 = arith.constant dense<0.000000e+00> : vector<1x256xf32>
    %58 = tpu.matmul %0, %57, %cst_40 {dimension_numbers = #tpu.dot_dimension_numbers<[1], [0], [0], [1], [0, 0, 1, 1], [], []>} : vector<1x256xf32>, vector<256x256xf32>, vector<1x256xf32> -> vector<1x256xf32>
    %c6_41 = arith.constant 6 : index
    %c0_42 = arith.constant 0 : index
    %c0_43 = arith.constant 0 : index
    %59 = vector.load %arg1[%c6_41, %c0_42, %c0_43] : memref<9x16x1xf32, #tpu.memory_space<vmem>>, vector<1x16x1xf32>
    %60 = vector.shape_cast %59 : vector<1x16x1xf32> to vector<16x1xf32>
    %61 = vector.broadcast %60 : vector<16x1xf32> to vector<16x256xf32>
    %62 = vector.broadcast %58 : vector<1x256xf32> to vector<16x256xf32>
    %63 = arith.mulf %61, %62 : vector<16x256xf32>
    %64 = arith.addf %55, %63 : vector<16x256xf32>
    %c7 = arith.constant 7 : index
    %c0_44 = arith.constant 0 : index
    %c0_45 = arith.constant 0 : index
    %65 = vector.load %arg2[%c7, %c0_44, %c0_45] : memref<9x256x256xf32, #tpu.memory_space<vmem>>, vector<1x256x256xf32>
    %66 = vector.shape_cast %65 : vector<1x256x256xf32> to vector<256x256xf32>
    %cst_46 = arith.constant dense<0.000000e+00> : vector<1x256xf32>
    %67 = tpu.matmul %0, %66, %cst_46 {dimension_numbers = #tpu.dot_dimension_numbers<[1], [0], [0], [1], [0, 0, 1, 1], [], []>} : vector<1x256xf32>, vector<256x256xf32>, vector<1x256xf32> -> vector<1x256xf32>
    %c7_47 = arith.constant 7 : index
    %c0_48 = arith.constant 0 : index
    %c0_49 = arith.constant 0 : index
    %68 = vector.load %arg1[%c7_47, %c0_48, %c0_49] : memref<9x16x1xf32, #tpu.memory_space<vmem>>, vector<1x16x1xf32>
    %69 = vector.shape_cast %68 : vector<1x16x1xf32> to vector<16x1xf32>
    %70 = vector.broadcast %69 : vector<16x1xf32> to vector<16x256xf32>
    %71 = vector.broadcast %67 : vector<1x256xf32> to vector<16x256xf32>
    %72 = arith.mulf %70, %71 : vector<16x256xf32>
    %73 = arith.addf %64, %72 : vector<16x256xf32>
    %c8 = arith.constant 8 : index
    %c0_50 = arith.constant 0 : index
    %c0_51 = arith.constant 0 : index
    %74 = vector.load %arg2[%c8, %c0_50, %c0_51] : memref<9x256x256xf32, #tpu.memory_space<vmem>>, vector<1x256x256xf32>
    %75 = vector.shape_cast %74 : vector<1x256x256xf32> to vector<256x256xf32>
    %cst_52 = arith.constant dense<0.000000e+00> : vector<1x256xf32>
    %76 = tpu.matmul %0, %75, %cst_52 {dimension_numbers = #tpu.dot_dimension_numbers<[1], [0], [0], [1], [0, 0, 1, 1], [], []>} : vector<1x256xf32>, vector<256x256xf32>, vector<1x256xf32> -> vector<1x256xf32>
    %c8_53 = arith.constant 8 : index
    %c0_54 = arith.constant 0 : index
    %c0_55 = arith.constant 0 : index
    %77 = vector.load %arg1[%c8_53, %c0_54, %c0_55] : memref<9x16x1xf32, #tpu.memory_space<vmem>>, vector<1x16x1xf32>
    %78 = vector.shape_cast %77 : vector<1x16x1xf32> to vector<16x1xf32>
    %79 = vector.broadcast %78 : vector<16x1xf32> to vector<16x256xf32>
    %80 = vector.broadcast %76 : vector<1x256xf32> to vector<16x256xf32>
    %81 = arith.mulf %79, %80 : vector<16x256xf32>
    %82 = arith.addf %73, %81 : vector<16x256xf32>
    %c0_56 = arith.constant 0 : index
    %c0_57 = arith.constant 0 : index
    %83 = vector.load %arg3[%c0_56, %c0_57] : memref<16x1xf32, #tpu.memory_space<vmem>>, vector<16x1xf32>
    %84 = vector.broadcast %83 : vector<16x1xf32> to vector<16x256xf32>
    %85 = arith.mulf %82, %84 : vector<16x256xf32>
    %c0_58 = arith.constant 0 : index
    %c0_59 = arith.constant 0 : index
    %86 = vector.load %arg4[%c0_58, %c0_59] : memref<16x1xf32, #tpu.memory_space<vmem>>, vector<16x1xf32>
    %87 = vector.broadcast %86 : vector<16x1xf32> to vector<16x256xf32>
    %88 = arith.addf %85, %87 : vector<16x256xf32>
    %cst_60 = arith.constant 1.000000e-01 : f32
    %89 = vector.broadcast %cst_60 : f32 to vector<16x256xf32>
    %90 = arith.mulf %89, %88 : vector<16x256xf32>
    %91 = arith.maximumf %88, %90 : vector<16x256xf32>
    %c0_61 = arith.constant 0 : index
    %c0_62 = arith.constant 0 : index
    %92 = vector.load %arg5[%c0_61, %c0_62] : memref<16x256xf32, #tpu.memory_space<vmem>>, vector<16x256xf32>
    tpu.vector_store %arg5[%c0_61, %c0_62], %91 {strides = array<i32>} : memref<16x256xf32, #tpu.memory_space<vmem>>, vector<16x256xf32>,
    return
  }
}

</mosaic_0001>

<bundles_post_ra>
// kernel: tpu_custom_call.1
= control target key start
LH: loop header
LB: loop body
LE: loop exit
PB: predicated region body
PF: predicated region fallthrough
CT: control target
= control target key end

     0   :  { %10 = vsyncpa [#allocation3], 0  ;;  %s2490_s0 = inlined_call_operand.hbm [shape: f32[1,256], index: 0, kind: input, shape index: {}]   ;;  %s2491_s1 = inlined_call_operand.vmem [shape: f32[9,16,1], index: 1, kind: input, shape index: {}]   ;;  %s2492_s2 = inlined_call_operand.hbm [shape: f32[9,256,256], index: 2, kind: input, shape index: {}]   ;;  %s2493_s3 = inlined_call_operand.vmem [shape: f32[16,1], index: 3, kind: input, shape index: {}]   ;;  %s2494_s4 = inlined_call_operand.vmem [shape: f32[16,1], index: 4, kind: input, shape index: {}]   ;;  %s2495_s5 = inlined_call_operand.hbm [shape: f32[16,256], index: 5, kind: output, shape index: {}]  }
   0x1   :  { %11 = vsyncpa [#allocation6], 0 }
   0x2   :  { %12 = vsyncpa [#allocation4], 0  ;;  %s2276_s18 = smov [#allocation2]   ;;  %s2277_s20 = smov [#allocation5]  }
   0x3   :  { %s19_s19 = sshll.u32 %s2276_s18, 4  ;;  %s30_s21 = sshll.u32 %s2277_s20, 4  ;;  %s20_s19 = int_to_ptr.vmem [resolvable:$true] %s19_s19  ;;  %s2312_s21 = int_to_ptr.vmem [resolvable:$true] %s30_s21 }
   0x4   :  { %s2204_s24 = scalar_lea.hbm %s2490_s0, 32 }
   0x5   :  { %p2205_p0 = scmp.ne.s32.totalorder %s2490_s0, %s2204_s24  ;;  %p2208_p1 = scmp.lt.u32.totalorder %s2204_s24, %s2490_s0 }
   0x7   :  { %p2210_p2 = pnand %p2208_p1, %p2205_p0 }
   0x9   :  { %2213 = shalt.err (!%p2210_p2)
}
   0xa   :  { %s2214_s29 = scalar_lea.vmem %s20_s19, 32  ;;  %p2219_p4 = scmp.lt.s32.totalorder %s20_s19, %s20_s19 }
   0xb   :  { %p2215_p3 = scmp.ne.s32.totalorder %s20_s19, %s2214_s29  ;;  %p2220_p5 = scmp.lt.s32.totalorder %s2214_s29, %s2214_s29 }
   0xd   :  { %p2221_p6 = por %p2220_p5, %p2219_p4 }
   0xf   :  { %p2222_p7 = pnand %p2221_p6, %p2215_p3 }
  0x11   :  { %2225 = shalt.err (!%p2222_p7)
}
  0x12   :  { %22 = dma.hbm_to_vmem [thread:$0]  %s2490_s0, 32, %s20_s19, [#allocation3]  }
  0x13   :  { %s2226_s9 = scalar_lea.hbm %s2492_s2, 73728 }
  0x14   :  { %p2227_p8 = scmp.ne.s32.totalorder %s2492_s2, %s2226_s9  ;;  %p2230_p9 = scmp.lt.u32.totalorder %s2226_s9, %s2492_s2 }
  0x16   :  { %p2232_p10 = pnand %p2230_p9, %p2227_p8 }
  0x18   :  { %2235 = shalt.err (!%p2232_p10)
}
  0x19   :  { %s2236_s14 = scalar_lea.vmem %s2312_s21, 73728  ;;  %p2241_p12 = scmp.lt.s32.totalorder %s2312_s21, %s2312_s21 }
  0x1a   :  { %p2237_p11 = scmp.ne.s32.totalorder %s2312_s21, %s2236_s14  ;;  %p2242_p13 = scmp.lt.s32.totalorder %s2236_s14, %s2236_s14 }
  0x1c   :  { %p2243_p0 = por %p2242_p13, %p2241_p12 }
  0x1e   :  { %p2244_p1 = pnand %p2243_p0, %p2237_p11 }
  0x20   :  { %2247 = shalt.err (!%p2244_p1)
}
  0x21   :  { %s2278_s0 = smov 256   ;;  %s2279_s15 = smov 16  }
  0x22   :  { %36 = dma.hbm_to_vmem [thread:$0]  %s2492_s2, 73728, %s2312_s21, [#allocation6], %s2278_s0, %s2278_s0, %s2279_s15  }
  0x23   :  { %2270 = dma.done.wait [#allocation3], 32  }
  0x24   :  { %2271 = vsyncadd [#allocation3], 4294967264 }
  0x25   :  { %2272 = dma.done.wait [#allocation6], 73728  }
  0x26   :  { %2273 = vsyncadd [#allocation6], 4294893568  ;;  %v49_v0 = vld [vmem:[#allocation5 + $0x8] sm:$0xff]  ;;  %v51_v1 = vld [vmem:[#allocation5 + $0x18] sm:$0xff] }
  0x27   :  { %v224_v2 = vld [vmem:[#allocation5 + $0x208] sm:$0xff]  ;;  %v1620_v3 = vpack.c.bf16 %v51_v1, %v49_v0  ;;  %v226_v4 = vld [vmem:[#allocation5 + $0x218] sm:$0xff]  ;;  %v48_v5 = vld [vmem:[#allocation5] sm:$0xff] }
  0x28   :  { %v50_v6 = vld [vmem:[#allocation5 + $0x10] sm:$0xff]  ;;  %v1684_v7 = vpack.c.bf16 %v226_v4, %v224_v2  ;;  %v223_v9 = vld [vmem:[#allocation5 + $0x200] sm:$0xff]  ;;  %v53_v11 = vld [vmem:[#allocation5 + $0x28] sm:$0xff] }
  0x29   :  { %v1622_v8 = vpack.c.bf16 %v50_v6, %v48_v5  ;;  %v225_v10 = vld [vmem:[#allocation5 + $0x210] sm:$0xff]  ;;  %1621 = vmatprep.subr.bf16.mxu0 %v1620_v3  ;;  %v55_v13 = vld [vmem:[#allocation5 + $0x38] sm:$0xff]  ;;  %v228_v14 = vld [vmem:[#allocation5 + $0x228] sm:$0xff] }
  0x2a   :  { %v1686_v12 = vpack.c.bf16 %v225_v10, %v223_v9  ;;  %v230_v15 = vld [vmem:[#allocation5 + $0x238] sm:$0xff]  ;;  %1685 = vmatprep.subr.bf16.mxu1 %v1684_v7  ;;  %v1624_v16 = vpack.c.bf16 %v55_v13, %v53_v11  ;;  %v52_v18 = vld [vmem:[#allocation5 + $0x20] sm:$0xff]  ;;  %v54_v19 = vld [vmem:[#allocation5 + $0x30] sm:$0xff] }
  0x2b   :  { %1623 = vmatpush1.bf16.msra.mxu0 %v1622_v8  ;;  %v1688_v17 = vpack.c.bf16 %v230_v15, %v228_v14  ;;  %v227_v20 = vld [vmem:[#allocation5 + $0x220] sm:$0xff]  ;;  %v1626_v21 = vpack.c.bf16 %v54_v19, %v52_v18  ;;  %v229_v22 = vld [vmem:[#allocation5 + $0x230] sm:$0xff]  ;;  %v57_v23 = vld [vmem:[#allocation5 + $0x48] sm:$0xff] }
  0x2c   :  { %1687 = vmatpush1.bf16.msra.mxu1 %v1686_v12  ;;  %v59_v24 = vld [vmem:[#allocation5 + $0x58] sm:$0xff]  ;;  %1625 = vmatprep.subr.bf16.mxu0 %v1624_v16  ;;  %v1690_v25 = vpack.c.bf16 %v229_v22, %v227_v20  ;;  %v232_v27 = vld [vmem:[#allocation5 + $0x248] sm:$0xff]  ;;  %v56_v29 = vld [vmem:[#allocation5 + $0x40] sm:$0xff]  ;;  %v2280_v20 = vmov 0  }
  0x2d   :  { %1689 = vmatprep.subr.bf16.mxu1 %v1688_v17  ;;  %v1628_v26 = vpack.c.bf16 %v59_v24, %v57_v23  ;;  %v234_v28 = vld [vmem:[#allocation5 + $0x258] sm:$0xff]  ;;  %v58_v31 = vld [vmem:[#allocation5 + $0x50] sm:$0xff]  ;;  %v231_v32 = vld [vmem:[#allocation5 + $0x240] sm:$0xff]  ;;  %2203 = vset.pattern.permute.xlu1 %v2280_v20 }
  0x2e   :  { %v1692_v30 = vpack.c.bf16 %v234_v28, %v232_v27  ;;  %v233_v33 = vld [vmem:[#allocation5 + $0x250] sm:$0xff]  ;;  %v1630_v34 = vpack.c.bf16 %v58_v31, %v56_v29  ;;  %v61_v35 = vld [vmem:[#allocation5 + $0x68] sm:$0xff]  ;;  %v63_v36 = vld [vmem:[#allocation5 + $0x78] sm:$0xff]  ;;  %2202 = vset.pattern.permute.xlu0 %v2280_v20 }
  0x2f   :  { %1627 = vmatpush1.bf16.msra.mxu0 %v1626_v21  ;;  %v236_v37 = vld [vmem:[#allocation5 + $0x268] sm:$0xff]  ;;  %v1694_v38 = vpack.c.bf16 %v233_v33, %v231_v32  ;;  %v1632_v39 = vpack.c.bf16 %v63_v36, %v61_v35  ;;  %v238_v40 = vld [vmem:[#allocation5 + $0x278] sm:$0xff]  ;;  %v60_v41 = vld [vmem:[#allocation5 + $0x60] sm:$0xff] }
  0x30   :  { %1691 = vmatpush1.bf16.msra.mxu1 %v1690_v25  ;;  %1629 = vmatprep.subr.bf16.mxu0 %v1628_v26  ;;  %v62_v42 = vld [vmem:[#allocation5 + $0x70] sm:$0xff]  ;;  %v1696_v43 = vpack.c.bf16 %v238_v40, %v236_v37  ;;  %v235_v44 = vld [vmem:[#allocation5 + $0x260] sm:$0xff]  ;;  %v65_v46 = vld [vmem:[#allocation5 + $0x88] sm:$0xff] }
  0x31   :  { %1693 = vmatprep.subr.bf16.mxu1 %v1692_v30  ;;  %v237_v45 = vld [vmem:[#allocation5 + $0x270] sm:$0xff]  ;;  %v67_v47 = vld [vmem:[#allocation5 + $0x98] sm:$0xff]  ;;  %v240_v48 = vld [vmem:[#allocation5 + $0x288] sm:$0xff]  ;;  %v1634_v50 = vpack.c.bf16 %v62_v42, %v60_v41 }
  0x32   :  { %v242_v49 = vld [vmem:[#allocation5 + $0x298] sm:$0xff]  ;;  %v1698_v51 = vpack.c.bf16 %v237_v45, %v235_v44  ;;  %v1636_v52 = vpack.c.bf16 %v67_v47, %v65_v46  ;;  %v64_v53 = vld [vmem:[#allocation5 + $0x80] sm:$0xff]  ;;  %v66_v54 = vld [vmem:[#allocation5 + $0x90] sm:$0xff]  ;;  %v113_v47 = vlaneseq }
  0x33   :  { %1631 = vmatpush1.bf16.msra.mxu0 %v1630_v34  ;;  %v239_v55 = vld [vmem:[#allocation5 + $0x280] sm:$0xff]  ;;  %v1700_v56 = vpack.c.bf16 %v242_v49, %v240_v48  ;;  %v241_v57 = vld [vmem:[#allocation5 + $0x290] sm:$0xff]  ;;  %v69_v58 = vld [vmem:[#allocation5 + $0xa8] sm:$0xff]  ;;  %v1638_v62 = vpack.c.bf16 %v66_v54, %v64_v53 }
  0x34   :  { %1695 = vmatpush1.bf16.msra.mxu1 %v1694_v38  ;;  %1633 = vmatprep.subr.bf16.mxu0 %v1632_v39  ;;  %v71_v59 = vld [vmem:[#allocation5 + $0xb8] sm:$0xff]  ;;  %v244_v60 = vld [vmem:[#allocation5 + $0x2a8] sm:$0xff]  ;;  %v1702_v63 = vpack.c.bf16 %v241_v57, %v239_v55  ;;  %v68_v1 = vld [vmem:[#allocation5 + $0xa0] sm:$0xff] }
  0x35   :  { %1697 = vmatprep.subr.bf16.mxu1 %v1696_v43  ;;  %v246_v61 = vld [vmem:[#allocation5 + $0x2b8] sm:$0xff]  ;;  %v1640_v0 = vpack.c.bf16 %v71_v59, %v69_v58  ;;  %v70_v2 = vld [vmem:[#allocation5 + $0xb0] sm:$0xff]  ;;  %v243_v3 = vld [vmem:[#allocation5 + $0x2a0] sm:$0xff] }
  0x36   :  { %v1704_v4 = vpack.c.bf16 %v246_v61, %v244_v60  ;;  %v245_v5 = vld [vmem:[#allocation5 + $0x2b0] sm:$0xff]  ;;  %v73_v6 = vld [vmem:[#allocation5 + $0xc8] sm:$0xff]  ;;  %v75_v7 = vld [vmem:[#allocation5 + $0xd8] sm:$0xff]  ;;  %v1642_v10 = vpack.c.bf16 %v70_v2, %v68_v1  ;;  %v2346_v60 = vshrl.u32 %v113_v47, 7 }
  0x37   :  { %1635 = vmatpush1.bf16.msra.mxu0 %v1634_v50  ;;  %v248_v8 = vld [vmem:[#allocation5 + $0x2c8] sm:$0xff]  ;;  %v250_v9 = vld [vmem:[#allocation5 + $0x2d8] sm:$0xff]  ;;  %v1706_v11 = vpack.c.bf16 %v245_v5, %v243_v3  ;;  %v1644_v12 = vpack.c.bf16 %v75_v7, %v73_v6  ;;  %v72_v13 = vld [vmem:[#allocation5 + $0xc0] sm:$0xff] }
  0x38   :  { %1699 = vmatpush1.bf16.msra.mxu1 %v1698_v51  ;;  %1637 = vmatprep.subr.bf16.mxu0 %v1636_v52  ;;  %v74_v14 = vld [vmem:[#allocation5 + $0xd0] sm:$0xff]  ;;  %v247_v15 = vld [vmem:[#allocation5 + $0x2c0] sm:$0xff]  ;;  %v1708_v16 = vpack.c.bf16 %v250_v9, %v248_v8  ;;  %v77_v18 = vld [vmem:[#allocation5 + $0xe8] sm:$0xff]  ;;  %v119_v9 = vsub.s32 1, %v2346_v60 }
  0x39   :  { %1701 = vmatprep.subr.bf16.mxu1 %v1700_v56  ;;  %v249_v17 = vld [vmem:[#allocation5 + $0x2d0] sm:$0xff]  ;;  %v79_v19 = vld [vmem:[#allocation5 + $0xf8] sm:$0xff]  ;;  %v252_v21 = vld [vmem:[#allocation5 + $0x2e8] sm:$0xff]  ;;  %v1646_v23 = vpack.c.bf16 %v74_v14, %v72_v13 }
  0x3a   :  { %v254_v22 = vld [vmem:[#allocation5 + $0x2f8] sm:$0xff]  ;;  %v1710_v24 = vpack.c.bf16 %v249_v17, %v247_v15  ;;  %v1648_v25 = vpack.c.bf16 %v79_v19, %v77_v18  ;;  %v76_v26 = vld [vmem:[#allocation5 + $0xe0] sm:$0xff]  ;;  %v78_v27 = vld [vmem:[#allocation5 + $0xf0] sm:$0xff] }
  0x3b   :  { %1639 = vmatpush1.bf16.msra.mxu0 %v1638_v62  ;;  %v251_v28 = vld [vmem:[#allocation5 + $0x2e0] sm:$0xff]  ;;  %v1712_v29 = vpack.c.bf16 %v254_v22, %v252_v21  ;;  %v253_v30 = vld [vmem:[#allocation5 + $0x2f0] sm:$0xff]  ;;  %v81_v31 = vld [vmem:[#allocation5 + $0x108] sm:$0xff]  ;;  %v1650_v35 = vpack.c.bf16 %v78_v27, %v76_v26 }
  0x3c   :  { %1703 = vmatpush1.bf16.msra.mxu1 %v1702_v63  ;;  %1641 = vmatprep.subr.bf16.mxu0 %v1640_v0  ;;  %v83_v32 = vld [vmem:[#allocation5 + $0x118] sm:$0xff]  ;;  %v256_v33 = vld [vmem:[#allocation5 + $0x308] sm:$0xff]  ;;  %v1714_v36 = vpack.c.bf16 %v253_v30, %v251_v28  ;;  %v80_v38 = vld [vmem:[#allocation5 + $0x100] sm:$0xff] }
  0x3d   :  { %1705 = vmatprep.subr.bf16.mxu1 %v1704_v4  ;;  %v258_v34 = vld [vmem:[#allocation5 + $0x318] sm:$0xff]  ;;  %v1652_v37 = vpack.c.bf16 %v83_v32, %v81_v31  ;;  %v82_v39 = vld [vmem:[#allocation5 + $0x110] sm:$0xff]  ;;  %v255_v40 = vld [vmem:[#allocation5 + $0x300] sm:$0xff] }
  0x3e   :  { %v1716_v41 = vpack.c.bf16 %v258_v34, %v256_v33  ;;  %v257_v42 = vld [vmem:[#allocation5 + $0x310] sm:$0xff]  ;;  %v85_v43 = vld [vmem:[#allocation5 + $0x128] sm:$0xff]  ;;  %v87_v44 = vld [vmem:[#allocation5 + $0x138] sm:$0xff]  ;;  %v1654_v48 = vpack.c.bf16 %v82_v39, %v80_v38 }
  0x3f   :  { %1643 = vmatpush1.bf16.msra.mxu0 %v1642_v10  ;;  %v260_v45 = vld [vmem:[#allocation5 + $0x328] sm:$0xff]  ;;  %v262_v46 = vld [vmem:[#allocation5 + $0x338] sm:$0xff]  ;;  %v1718_v49 = vpack.c.bf16 %v257_v42, %v255_v40  ;;  %v1656_v50 = vpack.c.bf16 %v87_v44, %v85_v43  ;;  %v84_v51 = vld [vmem:[#allocation5 + $0x120] sm:$0xff] }
  0x40   :  { %1707 = vmatpush1.bf16.msra.mxu1 %v1706_v11  ;;  %1645 = vmatprep.subr.bf16.mxu0 %v1644_v12  ;;  %v86_v52 = vld [vmem:[#allocation5 + $0x130] sm:$0xff]  ;;  %v259_v53 = vld [vmem:[#allocation5 + $0x320] sm:$0xff]  ;;  %v1720_v54 = vpack.c.bf16 %v262_v46, %v260_v45  ;;  %v89_v56 = vld [vmem:[#allocation5 + $0x148] sm:$0xff] }
  0x41   :  { %1709 = vmatprep.subr.bf16.mxu1 %v1708_v16  ;;  %v261_v55 = vld [vmem:[#allocation5 + $0x330] sm:$0xff]  ;;  %v91_v57 = vld [vmem:[#allocation5 + $0x158] sm:$0xff]  ;;  %v264_v58 = vld [vmem:[#allocation5 + $0x348] sm:$0xff]  ;;  %v1658_v61 = vpack.c.bf16 %v86_v52, %v84_v51 }
  0x42   :  { %v266_v59 = vld [vmem:[#allocation5 + $0x358] sm:$0xff]  ;;  %v1722_v62 = vpack.c.bf16 %v261_v55, %v259_v53  ;;  %v1660_v63 = vpack.c.bf16 %v91_v57, %v89_v56  ;;  %v88_v0 = vld [vmem:[#allocation5 + $0x140] sm:$0xff]  ;;  %v90_v1 = vld [vmem:[#allocation5 + $0x150] sm:$0xff] }
  0x43   :  { %1647 = vmatpush1.bf16.msra.mxu0 %v1646_v23  ;;  %v263_v2 = vld [vmem:[#allocation5 + $0x340] sm:$0xff]  ;;  %v1724_v3 = vpack.c.bf16 %v266_v59, %v264_v58  ;;  %v265_v4 = vld [vmem:[#allocation5 + $0x350] sm:$0xff]  ;;  %v93_v5 = vld [vmem:[#allocation5 + $0x168] sm:$0xff]  ;;  %v1662_v10 = vpack.c.bf16 %v90_v1, %v88_v0 }
  0x44   :  { %1711 = vmatpush1.bf16.msra.mxu1 %v1710_v24  ;;  %1649 = vmatprep.subr.bf16.mxu0 %v1648_v25  ;;  %v95_v6 = vld [vmem:[#allocation5 + $0x178] sm:$0xff]  ;;  %v268_v7 = vld [vmem:[#allocation5 + $0x368] sm:$0xff]  ;;  %v92_v11 = vld [vmem:[#allocation5 + $0x160] sm:$0xff]  ;;  %v1726_v12 = vpack.c.bf16 %v265_v4, %v263_v2 }
  0x45   :  { %1713 = vmatprep.subr.bf16.mxu1 %v1712_v29  ;;  %v270_v8 = vld [vmem:[#allocation5 + $0x378] sm:$0xff]  ;;  %v1664_v13 = vpack.c.bf16 %v95_v6, %v93_v5  ;;  %v94_v14 = vld [vmem:[#allocation5 + $0x170] sm:$0xff]  ;;  %v267_v15 = vld [vmem:[#allocation5 + $0x360] sm:$0xff] }
  0x46   :  { %v269_v16 = vld [vmem:[#allocation5 + $0x370] sm:$0xff]  ;;  %v1728_v17 = vpack.c.bf16 %v270_v8, %v268_v7  ;;  %v97_v18 = vld [vmem:[#allocation5 + $0x188] sm:$0xff]  ;;  %v99_v19 = vld [vmem:[#allocation5 + $0x198] sm:$0xff]  ;;  %v1666_v24 = vpack.c.bf16 %v94_v14, %v92_v11  ;;  %v2357_v7 = vsub.s32 0, %v2346_v60 }
  0x47   :  { %1651 = vmatpush1.bf16.msra.mxu0 %v1650_v35  ;;  %v2349_v20 = vld [vmem:[#allocation2] sm:$0x3]  ;;  %v272_v21 = vld [vmem:[#allocation5 + $0x388] sm:$0xff]  ;;  %v1730_v25 = vpack.c.bf16 %v269_v16, %v267_v15  ;;  %v1668_v26 = vpack.c.bf16 %v99_v19, %v97_v18  ;;  %v96_v27 = vld [vmem:[#allocation5 + $0x180] sm:$0xff] }
  0x48   :  { %1715 = vmatpush1.bf16.msra.mxu1 %v1714_v36  ;;  %1653 = vmatprep.subr.bf16.mxu0 %v1652_v37  ;;  %v274_v22 = vld [vmem:[#allocation5 + $0x398] sm:$0xff]  ;;  %v2352_v23 = vrot.slane %v2349_v20, %v119_v9  ;;  %v98_v28 = vld [vmem:[#allocation5 + $0x190] sm:$0xff]  ;;  %v271_v29 = vld [vmem:[#allocation5 + $0x380] sm:$0xff]  ;;  %v2361_v60 = vrot.slane %v2349_v20, %v2357_v7 }
  0x49   :  { %1717 = vmatprep.subr.bf16.mxu1 %v1716_v41  ;;  %v1732_v30 = vpack.c.bf16 %v274_v22, %v272_v21  ;;  %v273_v31 = vld [vmem:[#allocation5 + $0x390] sm:$0xff]  ;;  %v101_v32 = vld [vmem:[#allocation5 + $0x1a8] sm:$0xff]  ;;  %v103_v33 = vld [vmem:[#allocation5 + $0x1b8] sm:$0xff]  ;;  %v1670_v36 = vpack.c.bf16 %v98_v28, %v96_v27 }
  0x4a   :  { %187 = vmatprep.mubr.f32.mxu0 %v2352_v23  ;;  %v276_v34 = vld [vmem:[#allocation5 + $0x3a8] sm:$0xff]  ;;  %v278_v35 = vld [vmem:[#allocation5 + $0x3b8] sm:$0xff]  ;;  %351 = vmatprep.mubr.f32.mxu1 %v2352_v23  ;;  %v1734_v37 = vpack.c.bf16 %v273_v31, %v271_v29  ;;  %v1672_v38 = vpack.c.bf16 %v103_v33, %v101_v32  ;;  %v100_v39 = vld [vmem:[#allocation5 + $0x1a0] sm:$0xff] }
  0x4b   :  { %1655 = vmatpush1.bf16.msra.mxu0 %v1654_v48  ;;  %v102_v40 = vld [vmem:[#allocation5 + $0x1b0] sm:$0xff]  ;;  %v275_v41 = vld [vmem:[#allocation5 + $0x3a0] sm:$0xff]  ;;  %v1736_v42 = vpack.c.bf16 %v278_v35, %v276_v34  ;;  %v105_v44 = vld [vmem:[#allocation5 + $0x1c8] sm:$0xff] }
  0x4c   :  { %1719 = vmatpush1.bf16.msra.mxu1 %v1718_v49  ;;  %1657 = vmatprep.subr.bf16.mxu0 %v1656_v50  ;;  %v277_v43 = vld [vmem:[#allocation5 + $0x3b0] sm:$0xff]  ;;  %v107_v45 = vld [vmem:[#allocation5 + $0x1d8] sm:$0xff]  ;;  %v280_v46 = vld [vmem:[#allocation5 + $0x3c8] sm:$0xff]  ;;  %v1674_v48 = vpack.c.bf16 %v102_v40, %v100_v39 }
  0x4d   :  { %1721 = vmatprep.subr.bf16.mxu1 %v1720_v54  ;;  %v282_v47 = vld [vmem:[#allocation5 + $0x3d8] sm:$0xff]  ;;  %v1738_v49 = vpack.c.bf16 %v277_v43, %v275_v41  ;;  %v1676_v50 = vpack.c.bf16 %v107_v45, %v105_v44  ;;  %v104_v51 = vld [vmem:[#allocation5 + $0x1c0] sm:$0xff]  ;;  %v106_v52 = vld [vmem:[#allocation5 + $0x1d0] sm:$0xff] }
  0x4e   :  { %v279_v53 = vld [vmem:[#allocation5 + $0x3c0] sm:$0xff]  ;;  %v1740_v54 = vpack.c.bf16 %v282_v47, %v280_v46  ;;  %v281_v55 = vld [vmem:[#allocation5 + $0x3d0] sm:$0xff]  ;;  %v109_v56 = vld [vmem:[#allocation5 + $0x1e8] sm:$0xff] }
  0x4f   :  { %1659 = vmatpush1.bf16.msra.mxu0 %v1658_v61  ;;  %v111_v57 = vld [vmem:[#allocation5 + $0x1f8] sm:$0xff]  ;;  %v284_v58 = vld [vmem:[#allocation5 + $0x3e8] sm:$0xff]  ;;  %v1678_v61 = vpack.c.bf16 %v106_v52, %v104_v51  ;;  %v108_v0 = vld [vmem:[#allocation5 + $0x1e0] sm:$0xff] }
  0x50   :  { %1723 = vmatpush1.bf16.msra.mxu1 %v1722_v62  ;;  %1661 = vmatprep.subr.bf16.mxu0 %v1660_v63  ;;  %v286_v59 = vld [vmem:[#allocation5 + $0x3f8] sm:$0xff]  ;;  %v1742_v62 = vpack.c.bf16 %v281_v55, %v279_v53  ;;  %v1680_v63 = vpack.c.bf16 %v111_v57, %v109_v56  ;;  %v110_v1 = vld [vmem:[#allocation5 + $0x1f0] sm:$0xff]  ;;  %v283_v2 = vld [vmem:[#allocation5 + $0x3e0] sm:$0xff] }
  0x51   :  { %1725 = vmatprep.subr.bf16.mxu1 %v1724_v3  ;;  %v1744_v3 = vpack.c.bf16 %v286_v59, %v284_v58  ;;  %v285_v4 = vld [vmem:[#allocation5 + $0x3f0] sm:$0xff]  ;;  %v389_v5 = vld [vmem:[#allocation5 + $0x408] sm:$0xff]  ;;  %v391_v6 = vld [vmem:[#allocation5 + $0x418] sm:$0xff] }
  0x52   :  { %v554_v8 = vld [vmem:[#allocation5 + $0x608] sm:$0xff]  ;;  %v556_v9 = vld [vmem:[#allocation5 + $0x618] sm:$0xff]  ;;  %v1746_v11 = vpack.c.bf16 %v285_v4, %v283_v2  ;;  %v390_v14 = vld [vmem:[#allocation5 + $0x410] sm:$0xff] }
  0x53   :  { %1663 = vmatpush1.bf16.msra.mxu0 %v1662_v10  ;;  %v1682_v10 = vpack.c.bf16 %v110_v1, %v108_v0  ;;  %v553_v15 = vld [vmem:[#allocation5 + $0x600] sm:$0xff]  ;;  %v1812_v16 = vpack.c.bf16 %v556_v9, %v554_v8  ;;  %v393_v18 = vld [vmem:[#allocation5 + $0x428] sm:$0xff]  ;;  %v395_v19 = vld [vmem:[#allocation5 + $0x438] sm:$0xff] }
  0x54   :  { %1727 = vmatpush1.bf16.msra.mxu1 %v1726_v12  ;;  %1665 = vmatprep.subr.bf16.mxu0 %v1664_v13  ;;  %v1748_v12 = vpack.c.bf16 %v391_v6, %v389_v5  ;;  %v388_v13 = vld [vmem:[#allocation5 + $0x400] sm:$0xff]  ;;  %v558_v21 = vld [vmem:[#allocation5 + $0x628] sm:$0xff]  ;;  %v560_v22 = vld [vmem:[#allocation5 + $0x638] sm:$0xff] }
  0x55   :  { %1729 = vmatprep.subr.bf16.mxu1 %v1728_v17  ;;  %v555_v17 = vld [vmem:[#allocation5 + $0x610] sm:$0xff]  ;;  %v392_v27 = vld [vmem:[#allocation5 + $0x420] sm:$0xff]  ;;  %v397_v32 = vld [vmem:[#allocation5 + $0x448] sm:$0xff] }
  0x56   :  { %v394_v28 = vld [vmem:[#allocation5 + $0x430] sm:$0xff]  ;;  %v557_v29 = vld [vmem:[#allocation5 + $0x620] sm:$0xff]  ;;  %v399_v33 = vld [vmem:[#allocation5 + $0x458] sm:$0xff] }
  0x57   :  { %1667 = vmatpush1.bf16.msra.mxu0 %v1666_v24  ;;  %v1750_v24 = vpack.c.bf16 %v390_v14, %v388_v13  ;;  %v559_v31 = vld [vmem:[#allocation5 + $0x630] sm:$0xff]  ;;  %v562_v20 = vld [vmem:[#allocation5 + $0x648] sm:$0xff]  ;;  %v564_v34 = vld [vmem:[#allocation5 + $0x658] sm:$0xff]  ;;  %v1754_v35 = vpack.c.bf16 %v394_v28, %v392_v27 }
  0x58   :  { %1731 = vmatpush1.bf16.msra.mxu1 %v1730_v25  ;;  %1669 = vmatprep.subr.bf16.mxu0 %v1668_v26  ;;  %v1814_v25 = vpack.c.bf16 %v555_v17, %v553_v15  ;;  %v1752_v26 = vpack.c.bf16 %v395_v19, %v393_v18  ;;  %v398_v39 = vld [vmem:[#allocation5 + $0x450] sm:$0xff]  ;;  %v561_v40 = vld [vmem:[#allocation5 + $0x640] sm:$0xff]  ;;  %v1820_v41 = vpack.c.bf16 %v564_v34, %v562_v20  ;;  %v401_v43 = vld [vmem:[#allocation5 + $0x468] sm:$0xff] }
  0x59   :  { %1733 = vmatprep.subr.bf16.mxu1 %v1732_v30  ;;  %v1816_v30 = vpack.c.bf16 %v560_v22, %v558_v21  ;;  %v403_v44 = vld [vmem:[#allocation5 + $0x478] sm:$0xff]  ;;  %v566_v45 = vld [vmem:[#allocation5 + $0x668] sm:$0xff]  ;;  %v402_v51 = vld [vmem:[#allocation5 + $0x470] sm:$0xff] }
  0x5a   :  { %v568_v46 = vld [vmem:[#allocation5 + $0x678] sm:$0xff]  ;;  %v565_v52 = vld [vmem:[#allocation5 + $0x660] sm:$0xff]  ;;  %v405_v55 = vld [vmem:[#allocation5 + $0x488] sm:$0xff] }
  0x5b   :  { %1671 = vmatpush1.bf16.msra.mxu0 %v1670_v36  ;;  %v1818_v36 = vpack.c.bf16 %v559_v31, %v557_v29  ;;  %v1824_v53 = vpack.c.bf16 %v568_v46, %v566_v45  ;;  %v407_v56 = vld [vmem:[#allocation5 + $0x498] sm:$0xff]  ;;  %v570_v57 = vld [vmem:[#allocation5 + $0x688] sm:$0xff]  ;;  %v406_v0 = vld [vmem:[#allocation5 + $0x490] sm:$0xff] }
  0x5c   :  { %1735 = vmatpush1.bf16.msra.mxu1 %v1734_v37  ;;  %1673 = vmatprep.subr.bf16.mxu0 %v1672_v38  ;;  %v1756_v37 = vpack.c.bf16 %v399_v33, %v397_v32  ;;  %v396_v38 = vld [vmem:[#allocation5 + $0x440] sm:$0xff]  ;;  %v572_v58 = vld [vmem:[#allocation5 + $0x698] sm:$0xff]  ;;  %v409_v4 = vld [vmem:[#allocation5 + $0x4a8] sm:$0xff] }
  0x5d   :  { %1737 = vmatprep.subr.bf16.mxu1 %v1736_v42  ;;  %v563_v42 = vld [vmem:[#allocation5 + $0x650] sm:$0xff]  ;;  %v1758_v47 = vpack.c.bf16 %v398_v39, %v396_v38  ;;  %v569_v1 = vld [vmem:[#allocation5 + $0x680] sm:$0xff]  ;;  %v1828_v2 = vpack.c.bf16 %v572_v58, %v570_v57  ;;  %v411_v5 = vld [vmem:[#allocation5 + $0x4b8] sm:$0xff] }
  0x5e   :  { %v574_v6 = vld [vmem:[#allocation5 + $0x6a8] sm:$0xff]  ;;  %v576_v8 = vld [vmem:[#allocation5 + $0x6b8] sm:$0xff]  ;;  %v410_v13 = vld [vmem:[#allocation5 + $0x4b0] sm:$0xff] }
  0x5f   :  { %1675 = vmatpush1.bf16.msra.mxu0 %v1674_v48  ;;  %v1822_v48 = vpack.c.bf16 %v563_v42, %v561_v40  ;;  %v573_v14 = vld [vmem:[#allocation5 + $0x6a0] sm:$0xff]  ;;  %v1832_v15 = vpack.c.bf16 %v576_v8, %v574_v6  ;;  %v413_v17 = vld [vmem:[#allocation5 + $0x4c8] sm:$0xff]  ;;  %v415_v18 = vld [vmem:[#allocation5 + $0x4d8] sm:$0xff] }
  0x60   :  { %1739 = vmatpush1.bf16.msra.mxu1 %v1738_v49  ;;  %1677 = vmatprep.subr.bf16.mxu0 %v1676_v50  ;;  %v1760_v49 = vpack.c.bf16 %v403_v44, %v401_v43  ;;  %v400_v50 = vld [vmem:[#allocation5 + $0x460] sm:$0xff]  ;;  %v578_v19 = vld [vmem:[#allocation5 + $0x6c8] sm:$0xff]  ;;  %v580_v21 = vld [vmem:[#allocation5 + $0x6d8] sm:$0xff] }
  0x61   :  { %1741 = vmatprep.subr.bf16.mxu1 %v1740_v54  ;;  %v567_v54 = vld [vmem:[#allocation5 + $0x670] sm:$0xff]  ;;  %v1762_v59 = vpack.c.bf16 %v402_v51, %v400_v50  ;;  %v577_v28 = vld [vmem:[#allocation5 + $0x6c0] sm:$0xff]  ;;  %v1836_v29 = vpack.c.bf16 %v580_v21, %v578_v19  ;;  %v417_v31 = vld [vmem:[#allocation5 + $0x4e8] sm:$0xff] }
  0x62   :  { %v414_v27 = vld [vmem:[#allocation5 + $0x4d0] sm:$0xff]  ;;  %v419_v32 = vld [vmem:[#allocation5 + $0x4f8] sm:$0xff]  ;;  %v582_v33 = vld [vmem:[#allocation5 + $0x6e8] sm:$0xff] }
  0x63   :  { %1679 = vmatpush1.bf16.msra.mxu0 %v1678_v61  ;;  %v1826_v61 = vpack.c.bf16 %v567_v54, %v565_v52  ;;  %v584_v20 = vld [vmem:[#allocation5 + $0x6f8] sm:$0xff]  ;;  %v418_v38 = vld [vmem:[#allocation5 + $0x4f0] sm:$0xff]  ;;  %v581_v39 = vld [vmem:[#allocation5 + $0x6e0] sm:$0xff] }
  0x64   :  { %1743 = vmatpush1.bf16.msra.mxu1 %v1742_v62  ;;  %1681 = vmatprep.subr.bf16.mxu0 %v1680_v63  ;;  %v1764_v62 = vpack.c.bf16 %v407_v56, %v405_v55  ;;  %v404_v63 = vld [vmem:[#allocation5 + $0x480] sm:$0xff]  ;;  %v1840_v40 = vpack.c.bf16 %v584_v20, %v582_v33  ;;  %v421_v42 = vld [vmem:[#allocation5 + $0x508] sm:$0xff]  ;;  %v423_v43 = vld [vmem:[#allocation5 + $0x518] sm:$0xff] }
  0x65   :  { %1745 = vmatprep.subr.bf16.mxu1 %v1744_v3  ;;  %v571_v3 = vld [vmem:[#allocation5 + $0x690] sm:$0xff]  ;;  %v1766_v9 = vpack.c.bf16 %v406_v0, %v404_v63  ;;  %v586_v44 = vld [vmem:[#allocation5 + $0x708] sm:$0xff]  ;;  %v588_v45 = vld [vmem:[#allocation5 + $0x718] sm:$0xff] }
  0x66   :  { %v422_v50 = vld [vmem:[#allocation5 + $0x510] sm:$0xff]  ;;  %v585_v51 = vld [vmem:[#allocation5 + $0x700] sm:$0xff]  ;;  %v1844_v52 = vpack.c.bf16 %v588_v45, %v586_v44  ;;  %v425_v54 = vld [vmem:[#allocation5 + $0x528] sm:$0xff] }
  0x67   :  { %1683 = vmatpush1.bf16.msra.mxu0 %v1682_v10  ;;  %v1830_v10 = vpack.c.bf16 %v571_v3, %v569_v1  ;;  %v427_v55 = vld [vmem:[#allocation5 + $0x538] sm:$0xff]  ;;  %v590_v56 = vld [vmem:[#allocation5 + $0x728] sm:$0xff]  ;;  %v589_v0 = vld [vmem:[#allocation5 + $0x720] sm:$0xff] }
  0x68   :  { %1747 = vmatpush1.bf16.msra.mxu1 %v1746_v11  ;;  %1749 = vmatprep.subr.bf16.mxu0 %v1748_v12  ;;  %v1768_v11 = vpack.c.bf16 %v411_v5, %v409_v4  ;;  %v408_v12 = vld [vmem:[#allocation5 + $0x4a0] sm:$0xff]  ;;  %v592_v57 = vld [vmem:[#allocation5 + $0x738] sm:$0xff]  ;;  %v1784_v63 = vpack.c.bf16 %v427_v55, %v425_v54  ;;  %v591_v1 = vld [vmem:[#allocation5 + $0x730] sm:$0xff] }
  0x69   :  { %1813 = vmatprep.subr.bf16.mxu1 %v1812_v16  ;;  %v575_v16 = vld [vmem:[#allocation5 + $0x6b0] sm:$0xff]  ;;  %v1770_v22 = vpack.c.bf16 %v410_v13, %v408_v12  ;;  %v1848_v3 = vpack.c.bf16 %v592_v57, %v590_v56  ;;  %v431_v4 = vld [vmem:[#allocation5 + $0x558] sm:$0xff]  ;;  %v594_v8 = vld [vmem:[#allocation5 + $0x748] sm:$0xff]  ;;  %v1850_v13 = vpack.c.bf16 %v591_v1, %v589_v0 }
  0x6a   :  { %188 = vmatmul.mubr.f32.vlgmr.msra.gmra.mrb[0].mxu0 %v2361_v60  ;;  %v1604_v5 = vld [vmem:[%s2491_s1 + $0x10] sm:$0xff]  ;;  %v194_v6 = vld [vmem:[%s2491_s1] sm:$0xff] }
  0x6b   :  { %352 = vmatmul.mubr.f32.vlgmr.msra.gmra.mrb[0].mxu1 %v2361_v60  ;;  %1751 = vmatpush1.bf16.msra.mxu0 %v1750_v24  ;;  %v1834_v24 = vpack.c.bf16 %v575_v16, %v573_v14  ;;  %v430_v12 = vld [vmem:[#allocation5 + $0x550] sm:$0xff]  ;;  %v433_v19 = vld [vmem:[#allocation5 + $0x568] sm:$0xff]  ;;  %v435_v21 = vld [vmem:[#allocation5 + $0x578] sm:$0xff] }
  0x6c   :  { %1815 = vmatpush1.bf16.msra.mxu1 %v1814_v25  ;;  %1753 = vmatprep.subr.bf16.mxu0 %v1752_v26  ;;  %v1772_v25 = vpack.c.bf16 %v415_v18, %v413_v17  ;;  %v412_v26 = vld [vmem:[#allocation5 + $0x4c0] sm:$0xff]  ;;  %v595_v16 = vld [vmem:[#allocation5 + $0x750] sm:$0xff]  ;;  %v437_v20 = vld [vmem:[#allocation5 + $0x588] sm:$0xff] }
  0x6d   :  { %1817 = vmatprep.subr.bf16.mxu1 %v1816_v30  ;;  %516 = vmatprep.mubr.f32.mxu0 %v2352_v23  ;;  %v579_v30 = vld [vmem:[#allocation5 + $0x6d0] sm:$0xff]  ;;  %v1774_v34 = vpack.c.bf16 %v414_v27, %v412_v26  ;;  %v441_v45 = vld [vmem:[#allocation5 + $0x5a8] sm:$0xff]  ;;  %v605_v54 = vld [vmem:[#allocation5 + $0x7a0] sm:$0xff] }
  0x6e   :  { %681 = vmatprep.mubr.f32.mxu1 %v2352_v23  ;;  %363 = vperm.xlu1 %2203, %v1604_v5   ;;  %v1605_v17 = vld [vmem:[%s2491_s1 + $0x18] sm:$0xff]  ;;  %v445_v57 = vld [vmem:[#allocation5 + $0x5c8] sm:$0xff]  ;;  %v444_v1 = vld [vmem:[#allocation5 + $0x5c0] sm:$0xff] }
  0x6f   :  { %1755 = vmatpush1.bf16.msra.mxu0 %v1754_v35  ;;  %v1838_v35 = vpack.c.bf16 %v579_v30, %v577_v28  ;;  %198 = vperm.xlu0 %2202, %v194_v6   ;;  %v1792_v28 = vpack.c.bf16 %v435_v21, %v433_v19  ;;  %v434_v30 = vld [vmem:[#allocation5 + $0x570] sm:$0xff]  ;;  %v449_v6 = vld [vmem:[#allocation5 + $0x5e8] sm:$0xff]  ;;  %v721_v21 = vld [vmem:[#allocation5 + $0x818] sm:$0xff] }
  0x70   :  { %1819 = vmatpush1.bf16.msra.mxu1 %v1818_v36  ;;  %1757 = vmatprep.subr.bf16.mxu0 %v1756_v37  ;;  %v1776_v36 = vpack.c.bf16 %v419_v32, %v417_v31  ;;  %v416_v37 = vld [vmem:[#allocation5 + $0x4e0] sm:$0xff]  ;;  %v599_v33 = vld [vmem:[#allocation5 + $0x770] sm:$0xff]  ;;  %v719_v19 = vld [vmem:[#allocation5 + $0x808] sm:$0xff] }
  0x71   :  { %1821 = vmatprep.subr.bf16.mxu1 %v1820_v41  ;;  %v583_v41 = vld [vmem:[#allocation5 + $0x6f0] sm:$0xff]  ;;  %v1778_v46 = vpack.c.bf16 %v418_v38, %v416_v37  ;;  %v597_v31 = vld [vmem:[#allocation5 + $0x760] sm:$0xff] }
  0x72   :  { %368 = vperm.xlu1 %2203, %v1605_v17   ;;  %v1858_v38 = vpack.c.bf16 %v599_v33, %v597_v31  ;;  %v603_v44 = vld [vmem:[#allocation5 + $0x790] sm:$0xff]  ;;  %v723_v33 = vld [vmem:[#allocation5 + $0x828] sm:$0xff] }
  0x73   :  { %1759 = vmatpush1.bf16.msra.mxu0 %v1758_v47  ;;  %v1842_v47 = vpack.c.bf16 %v583_v41, %v581_v39  ;;  %v438_v41 = vld [vmem:[#allocation5 + $0x590] sm:$0xff] }
  0x74   :  { %1823 = vmatpush1.bf16.msra.mxu1 %v1822_v48  ;;  %1761 = vmatprep.subr.bf16.mxu0 %v1760_v49  ;;  %v1780_v48 = vpack.c.bf16 %v423_v43, %v421_v42  ;;  %v420_v49 = vld [vmem:[#allocation5 + $0x500] sm:$0xff]  ;;  %v607_v56 = vld [vmem:[#allocation5 + $0x7b0] sm:$0xff] }
  0x75   :  { %1825 = vmatprep.subr.bf16.mxu1 %v1824_v53  ;;  %v587_v53 = vld [vmem:[#allocation5 + $0x710] sm:$0xff]  ;;  %v1782_v58 = vpack.c.bf16 %v422_v50, %v420_v49  ;;  %v601_v42 = vld [vmem:[#allocation5 + $0x780] sm:$0xff] }
  0x76   :  { %v1862_v50 = vpack.c.bf16 %v603_v44, %v601_v42  ;;  %v611_v5 = vld [vmem:[#allocation5 + $0x7d0] sm:$0xff]  ;;  %v727_v44 = vld [vmem:[#allocation5 + $0x848] sm:$0xff] }
  0x77   :  { %1763 = vmatpush1.bf16.msra.mxu0 %v1762_v59  ;;  %v424_v59 = vld [vmem:[#allocation5 + $0x520] sm:$0xff] }
  0x78   :  { %1827 = vmatpush1.bf16.msra.mxu1 %v1826_v61  ;;  %1765 = vmatprep.subr.bf16.mxu0 %v1764_v62  ;;  %v426_v61 = vld [vmem:[#allocation5 + $0x530] sm:$0xff]  ;;  %v1846_v62 = vpack.c.bf16 %v587_v53, %v585_v51 }
  0x79   :  { %1829 = vmatprep.subr.bf16.mxu1 %v1828_v2  ;;  %v429_v2 = vld [vmem:[#allocation5 + $0x548] sm:$0xff]  ;;  %v442_v53 = vld [vmem:[#allocation5 + $0x5b0] sm:$0xff] }
  0x7a   :  { %v1788_v14 = vpack.c.bf16 %v431_v4, %v429_v2  ;;  %v446_v2 = vld [vmem:[#allocation5 + $0x5d0] sm:$0xff] }
  0x7b   :  { %1767 = vmatpush1.bf16.msra.mxu0 %v1766_v9  ;;  %v596_v9 = vld [vmem:[#allocation5 + $0x758] sm:$0xff] }
  0x7c   :  { %1831 = vmatpush1.bf16.msra.mxu1 %v1830_v10  ;;  %1769 = vmatprep.subr.bf16.mxu0 %v1768_v11  ;;  %v1786_v10 = vpack.c.bf16 %v426_v61, %v424_v59  ;;  %v428_v11 = vld [vmem:[#allocation5 + $0x540] sm:$0xff]  ;;  %v1852_v18 = vpack.c.bf16 %v596_v9, %v594_v8  ;;  %v610_v59 = vld [vmem:[#allocation5 + $0x7c8] sm:$0xff]  ;;  %v612_v61 = vld [vmem:[#allocation5 + $0x7d8] sm:$0xff] }
  0x7d   :  { %1833 = vmatprep.subr.bf16.mxu1 %v1832_v15  ;;  %v593_v15 = vld [vmem:[#allocation5 + $0x740] sm:$0xff]  ;;  %v1790_v26 = vpack.c.bf16 %v430_v12, %v428_v11  ;;  %v1868_v4 = vpack.c.bf16 %v612_v61, %v610_v59  ;;  %v451_v8 = vld [vmem:[#allocation5 + $0x5f8] sm:$0xff]  ;;  %v614_v9 = vld [vmem:[#allocation5 + $0x7e8] sm:$0xff]  ;;  %v1806_v11 = vpack.c.bf16 %v446_v2, %v444_v1 }
  0x7e   :  { %v1854_v27 = vpack.c.bf16 %v595_v16, %v593_v15  ;;  %v450_v15 = vld [vmem:[#allocation5 + $0x5f0] sm:$0xff]  ;;  %v613_v16 = vld [vmem:[#allocation5 + $0x7e0] sm:$0xff]  ;;  %v898_v59 = vld [vmem:[#allocation5 + $0xa78] sm:$0xff] }
  0x7f   :  { %1771 = vmatpush1.bf16.msra.mxu0 %v1770_v22  ;;  %v195_v22 = vld [vmem:[%s2491_s1 + $0x8] sm:$0xff]  ;;  %v732_v1 = vld [vmem:[#allocation5 + $0x870] sm:$0xff] }
  0x80   :  { %1835 = vmatpush1.bf16.msra.mxu1 %v1834_v24  ;;  %1773 = vmatprep.subr.bf16.mxu0 %v1772_v25  ;;  %v598_v24 = vld [vmem:[#allocation5 + $0x768] sm:$0xff]  ;;  %v600_v25 = vld [vmem:[#allocation5 + $0x778] sm:$0xff]  ;;  %v895_v2 = vld [vmem:[#allocation5 + $0xa60] sm:$0xff] }
  0x81   :  { %1837 = vmatprep.subr.bf16.mxu1 %v1836_v29  ;;  %203 = vperm.xlu0 %2202, %v195_v22   ;;  %v432_v29 = vld [vmem:[#allocation5 + $0x560] sm:$0xff]  ;;  %v1856_v32 = vpack.c.bf16 %v600_v25, %v598_v24  ;;  %v884_v22 = vld [vmem:[#allocation5 + $0xa08] sm:$0xff]  ;;  %v886_v24 = vld [vmem:[#allocation5 + $0xa18] sm:$0xff] }
  0x82   :  { %v1794_v37 = vpack.c.bf16 %v434_v30, %v432_v29  ;;  %v720_v29 = vld [vmem:[#allocation5 + $0x810] sm:$0xff]  ;;  %v883_v30 = vld [vmem:[#allocation5 + $0xa00] sm:$0xff]  ;;  %v1940_v31 = vpack.c.bf16 %v886_v24, %v884_v22  ;;  %v906_v22 = vld [vmem:[#allocation5 + $0xab8] sm:$0xff] }
  0x83   :  { %1775 = vmatpush1.bf16.msra.mxu0 %v1774_v34  ;;  %v439_v34 = vld [vmem:[#allocation5 + $0x598] sm:$0xff]  ;;  %v1607_v24 = vld [vmem:[%s2491_s1 + $0x28] sm:$0xff] }
  0x84   :  { %1839 = vmatpush1.bf16.msra.mxu1 %v1838_v35  ;;  %1777 = vmatprep.subr.bf16.mxu0 %v1776_v36  ;;  %v602_v35 = vld [vmem:[#allocation5 + $0x788] sm:$0xff]  ;;  %v604_v36 = vld [vmem:[#allocation5 + $0x798] sm:$0xff]  ;;  %v1796_v39 = vpack.c.bf16 %v439_v34, %v437_v20 }
  0x85   :  { %1841 = vmatprep.subr.bf16.mxu1 %v1840_v40  ;;  %v436_v40 = vld [vmem:[#allocation5 + $0x580] sm:$0xff]  ;;  %v1860_v43 = vpack.c.bf16 %v604_v36, %v602_v35  ;;  %v725_v20 = vld [vmem:[#allocation5 + $0x838] sm:$0xff]  ;;  %v888_v34 = vld [vmem:[#allocation5 + $0xa28] sm:$0xff]  ;;  %533 = vperm.xlu1 %2203, %v1607_v24  }
  0x86   :  { %v1798_v49 = vpack.c.bf16 %v438_v41, %v436_v40  ;;  %v890_v35 = vld [vmem:[#allocation5 + $0xa38] sm:$0xff]  ;;  %v724_v40 = vld [vmem:[#allocation5 + $0x830] sm:$0xff]  ;;  %v887_v41 = vld [vmem:[#allocation5 + $0xa20] sm:$0xff] }
  0x87   :  { %1779 = vmatpush1.bf16.msra.mxu0 %v1778_v46  ;;  %v443_v46 = vld [vmem:[#allocation5 + $0x5b8] sm:$0xff]  ;;  %v1944_v42 = vpack.c.bf16 %v890_v35, %v888_v34 }
  0x88   :  { %1843 = vmatpush1.bf16.msra.mxu1 %v1842_v47  ;;  %1781 = vmatprep.subr.bf16.mxu0 %v1780_v48  ;;  %v606_v47 = vld [vmem:[#allocation5 + $0x7a8] sm:$0xff]  ;;  %v608_v48 = vld [vmem:[#allocation5 + $0x7b8] sm:$0xff]  ;;  %v1800_v51 = vpack.c.bf16 %v443_v46, %v441_v45 }
  0x89   :  { %1845 = vmatprep.subr.bf16.mxu1 %v1844_v52  ;;  %v440_v52 = vld [vmem:[#allocation5 + $0x5a0] sm:$0xff]  ;;  %v1864_v55 = vpack.c.bf16 %v608_v48, %v606_v47  ;;  %v729_v45 = vld [vmem:[#allocation5 + $0x858] sm:$0xff]  ;;  %v892_v46 = vld [vmem:[#allocation5 + $0xa48] sm:$0xff] }
  0x8a   :  { %v894_v47 = vld [vmem:[#allocation5 + $0xa58] sm:$0xff] }
  0x8b   :  { %1783 = vmatpush1.bf16.msra.mxu0 %v1782_v58  ;;  %v447_v58 = vld [vmem:[#allocation5 + $0x5d8] sm:$0xff] }
  0x8c   :  { %1847 = vmatpush1.bf16.msra.mxu1 %v1846_v62  ;;  %1785 = vmatprep.subr.bf16.mxu0 %v1784_v63  ;;  %v1802_v62 = vpack.c.bf16 %v442_v53, %v440_v52  ;;  %v1866_v63 = vpack.c.bf16 %v607_v56, %v605_v54  ;;  %v1804_v0 = vpack.c.bf16 %v447_v58, %v445_v57  ;;  %v728_v52 = vld [vmem:[#allocation5 + $0x850] sm:$0xff]  ;;  %v891_v53 = vld [vmem:[#allocation5 + $0xa40] sm:$0xff]  ;;  %v731_v56 = vld [vmem:[#allocation5 + $0x868] sm:$0xff] }
  0x8d   :  { %1849 = vmatprep.subr.bf16.mxu1 %v1848_v3  ;;  %v609_v3 = vld [vmem:[#allocation5 + $0x7c0] sm:$0xff]  ;;  %v1948_v54 = vpack.c.bf16 %v894_v47, %v892_v46  ;;  %v733_v57 = vld [vmem:[#allocation5 + $0x878] sm:$0xff]  ;;  %v896_v58 = vld [vmem:[#allocation5 + $0xa68] sm:$0xff] }
  0x8e   :  { %v1870_v12 = vpack.c.bf16 %v611_v5, %v609_v3  ;;  %v1952_v3 = vpack.c.bf16 %v898_v59, %v896_v58  ;;  %v735_v5 = vld [vmem:[#allocation5 + $0x888] sm:$0xff]  ;;  %v745_v34 = vld [vmem:[#allocation5 + $0x8d8] sm:$0xff]  ;;  %v909_v46 = vld [vmem:[#allocation5 + $0xad0] sm:$0xff] }
  0x8f   :  { %1787 = vmatpush1.bf16.msra.mxu0 %v1786_v10  ;;  %v616_v10 = vld [vmem:[#allocation5 + $0x7f8] sm:$0xff]  ;;  %v747_v47 = vld [vmem:[#allocation5 + $0x8e8] sm:$0xff]  ;;  %v913_v58 = vld [vmem:[#allocation5 + $0xaf0] sm:$0xff] }
  0x90   :  { %1851 = vmatpush1.bf16.msra.mxu1 %v1850_v13  ;;  %1789 = vmatprep.subr.bf16.mxu0 %v1788_v14  ;;  %v1808_v13 = vpack.c.bf16 %v451_v8, %v449_v6  ;;  %v448_v14 = vld [vmem:[#allocation5 + $0x5e0] sm:$0xff]  ;;  %v1872_v17 = vpack.c.bf16 %v616_v10, %v614_v9  ;;  %v737_v6 = vld [vmem:[#allocation5 + $0x898] sm:$0xff]  ;;  %v900_v8 = vld [vmem:[#allocation5 + $0xa88] sm:$0xff] }
  0x91   :  { %1853 = vmatprep.subr.bf16.mxu1 %v1852_v18  ;;  %v615_v18 = vld [vmem:[#allocation5 + $0x7f0] sm:$0xff]  ;;  %v1810_v25 = vpack.c.bf16 %v450_v15, %v448_v14  ;;  %v902_v9 = vld [vmem:[#allocation5 + $0xa98] sm:$0xff]  ;;  %v899_v15 = vld [vmem:[#allocation5 + $0xa80] sm:$0xff] }
  0x92   :  { %v736_v14 = vld [vmem:[#allocation5 + $0x890] sm:$0xff]  ;;  %v751_v59 = vld [vmem:[#allocation5 + $0x908] sm:$0xff]  ;;  %v761_v24 = vld [vmem:[#allocation5 + $0x958] sm:$0xff] }
  0x93   :  { %1791 = vmatpush1.bf16.msra.mxu0 %v1790_v26  ;;  %v1874_v26 = vpack.c.bf16 %v615_v18, %v613_v16  ;;  %v901_v16 = vld [vmem:[#allocation5 + $0xa90] sm:$0xff]  ;;  %v739_v18 = vld [vmem:[#allocation5 + $0x8a8] sm:$0xff] }
  0x94   :  { %1855 = vmatpush1.bf16.msra.mxu1 %v1854_v27  ;;  %1793 = vmatprep.subr.bf16.mxu0 %v1792_v28  ;;  %v1876_v27 = vpack.c.bf16 %v721_v21, %v719_v19  ;;  %v718_v28 = vld [vmem:[#allocation5 + $0x800] sm:$0xff]  ;;  %v741_v19 = vld [vmem:[#allocation5 + $0x8b8] sm:$0xff]  ;;  %v904_v21 = vld [vmem:[#allocation5 + $0xaa8] sm:$0xff] }
  0x95   :  { %1857 = vmatprep.subr.bf16.mxu1 %v1856_v32  ;;  %v885_v32 = vld [vmem:[#allocation5 + $0xa10] sm:$0xff]  ;;  %v1878_v36 = vpack.c.bf16 %v720_v29, %v718_v28  ;;  %v1958_v28 = vpack.c.bf16 %v901_v16, %v899_v15  ;;  %v1896_v29 = vpack.c.bf16 %v741_v19, %v739_v18  ;;  %v754_v16 = vld [vmem:[#allocation5 + $0x920] sm:$0xff] }
  0x96   :  { %v1609_v35 = vld [vmem:[%s2491_s1 + $0x38] sm:$0xff]  ;;  %v919_v18 = vld [vmem:[#allocation5 + $0xb20] sm:$0xff] }
  0x97   :  { %1795 = vmatpush1.bf16.msra.mxu0 %v1794_v37  ;;  %v1942_v37 = vpack.c.bf16 %v885_v32, %v883_v30  ;;  %v740_v30 = vld [vmem:[#allocation5 + $0x8b0] sm:$0xff]  ;;  %698 = vperm.xlu1 %2203, %v1609_v35   ;;  %v765_v35 = vld [vmem:[#allocation5 + $0x978] sm:$0xff] }
  0x98   :  { %1859 = vmatpush1.bf16.msra.mxu1 %v1858_v38  ;;  %1797 = vmatprep.subr.bf16.mxu0 %v1796_v39  ;;  %v1880_v38 = vpack.c.bf16 %v725_v20, %v723_v33  ;;  %v722_v39 = vld [vmem:[#allocation5 + $0x820] sm:$0xff]  ;;  %v905_v32 = vld [vmem:[#allocation5 + $0xab0] sm:$0xff]  ;;  %v1960_v33 = vpack.c.bf16 %v906_v22, %v904_v21  ;;  %v743_v20 = vld [vmem:[#allocation5 + $0x8c8] sm:$0xff] }
  0x99   :  { %1861 = vmatprep.subr.bf16.mxu1 %v1860_v43  ;;  %v889_v43 = vld [vmem:[#allocation5 + $0xa30] sm:$0xff]  ;;  %v1882_v48 = vpack.c.bf16 %v724_v40, %v722_v39  ;;  %v759_v22 = vld [vmem:[#allocation5 + $0x948] sm:$0xff] }
  0x9a   :  { %v921_v21 = vld [vmem:[#allocation5 + $0xb30] sm:$0xff] }
  0x9b   :  { %1799 = vmatpush1.bf16.msra.mxu0 %v1798_v49  ;;  %v1946_v49 = vpack.c.bf16 %v889_v43, %v887_v41  ;;  %v1900_v41 = vpack.c.bf16 %v745_v34, %v743_v20  ;;  %v744_v43 = vld [vmem:[#allocation5 + $0x8d0] sm:$0xff]  ;;  %v763_v34 = vld [vmem:[#allocation5 + $0x968] sm:$0xff] }
  0x9c   :  { %1863 = vmatpush1.bf16.msra.mxu1 %v1862_v50  ;;  %1801 = vmatprep.subr.bf16.mxu0 %v1800_v51  ;;  %v1884_v50 = vpack.c.bf16 %v729_v45, %v727_v44  ;;  %v726_v51 = vld [vmem:[#allocation5 + $0x840] sm:$0xff]  ;;  %v925_v20 = vld [vmem:[#allocation5 + $0xb50] sm:$0xff] }
  0x9d   :  { %1865 = vmatprep.subr.bf16.mxu1 %v1864_v55  ;;  %v893_v55 = vld [vmem:[#allocation5 + $0xa50] sm:$0xff]  ;;  %v1886_v61 = vpack.c.bf16 %v728_v52, %v726_v51  ;;  %v907_v44 = vld [vmem:[#allocation5 + $0xac0] sm:$0xff] }
  0x9e   :  { %v1966_v52 = vpack.c.bf16 %v909_v46, %v907_v44  ;;  %v767_v46 = vld [vmem:[#allocation5 + $0x988] sm:$0xff] }
  0x9f   :  { %1803 = vmatpush1.bf16.msra.mxu0 %v1802_v62  ;;  %v1950_v62 = vpack.c.bf16 %v893_v55, %v891_v53  ;;  %v748_v55 = vld [vmem:[#allocation5 + $0x8f0] sm:$0xff] }
  0xa0   :  { %1867 = vmatpush1.bf16.msra.mxu1 %v1866_v63  ;;  %1805 = vmatprep.subr.bf16.mxu0 %v1804_v0  ;;  %v1888_v63 = vpack.c.bf16 %v733_v57, %v731_v56  ;;  %v730_v0 = vld [vmem:[#allocation5 + $0x860] sm:$0xff] }
  0xa1   :  { %1869 = vmatprep.subr.bf16.mxu1 %v1868_v4  ;;  %v897_v4 = vld [vmem:[#allocation5 + $0xa70] sm:$0xff]  ;;  %v1890_v10 = vpack.c.bf16 %v732_v1, %v730_v0  ;;  %v911_v56 = vld [vmem:[#allocation5 + $0xae0] sm:$0xff] }
  0xa2   :  { %v1970_v1 = vpack.c.bf16 %v913_v58, %v911_v56  ;;  %v771_v58 = vld [vmem:[#allocation5 + $0x9a8] sm:$0xff] }
  0xa3   :  { %1807 = vmatpush1.bf16.msra.mxu0 %v1806_v11  ;;  %v734_v11 = vld [vmem:[#allocation5 + $0x880] sm:$0xff] }
  0xa4   :  { %1871 = vmatpush1.bf16.msra.mxu1 %v1870_v12  ;;  %1809 = vmatprep.subr.bf16.mxu0 %v1808_v13  ;;  %v1954_v12 = vpack.c.bf16 %v897_v4, %v895_v2  ;;  %v1892_v13 = vpack.c.bf16 %v737_v6, %v735_v5  ;;  %v752_v4 = vld [vmem:[#allocation5 + $0x910] sm:$0xff]  ;;  %v915_v5 = vld [vmem:[#allocation5 + $0xb00] sm:$0xff] }
  0xa5   :  { %1873 = vmatprep.subr.bf16.mxu1 %v1872_v17  ;;  %v1956_v17 = vpack.c.bf16 %v902_v9, %v900_v8  ;;  %v917_v8 = vld [vmem:[#allocation5 + $0xb10] sm:$0xff]  ;;  %v755_v9 = vld [vmem:[#allocation5 + $0x928] sm:$0xff] }
  0xa7   :  { %1811 = vmatpush1.bf16.msra.mxu0 %v1810_v25  ;;  %v1606_v25 = vld [vmem:[%s2491_s1 + $0x20] sm:$0xff] }
  0xa8   :  { %1875 = vmatpush1.bf16.msra.mxu1 %v1874_v26  ;;  %1877 = vmatprep.subr.bf16.mxu0 %v1876_v27  ;;  %v1894_v26 = vpack.c.bf16 %v736_v14, %v734_v11  ;;  %v738_v27 = vld [vmem:[#allocation5 + $0x8a0] sm:$0xff]  ;;  %v920_v11 = vld [vmem:[#allocation5 + $0xb28] sm:$0xff]  ;;  %v1974_v14 = vpack.c.bf16 %v917_v8, %v915_v5 }
  0xa9   :  { %1941 = vmatprep.subr.bf16.mxu1 %v1940_v31  ;;  %v903_v31 = vld [vmem:[#allocation5 + $0xaa0] sm:$0xff]  ;;  %528 = vperm.xlu0 %2202, %v1606_v25   ;;  %v1898_v39 = vpack.c.bf16 %v740_v30, %v738_v27  ;;  %v924_v25 = vld [vmem:[#allocation5 + $0xb48] sm:$0xff] }
  0xaa   :  { %517 = vmatmul.mubr.f32.vlgmr.msra.gmra.mrb[2].mxu0 %v2361_v60  ;;  %v1962_v40 = vpack.c.bf16 %v905_v32, %v903_v31  ;;  %v758_v30 = vld [vmem:[#allocation5 + $0x940] sm:$0xff]  ;;  %v760_v31 = vld [vmem:[#allocation5 + $0x950] sm:$0xff]  ;;  %v775_v8 = vld [vmem:[#allocation5 + $0x9c8] sm:$0xff] }
  0xab   :  { %1879 = vmatpush1.bf16.msra.mxu0 %v1878_v36  ;;  %682 = vmatmul.mubr.f32.vlgmr.msra.gmra.mrb[2].mxu1 %v2361_v60  ;;  %v908_v36 = vld [vmem:[#allocation5 + $0xac8] sm:$0xff]  ;;  %v923_v32 = vld [vmem:[#allocation5 + $0xb40] sm:$0xff] }
  0xac   :  { %1943 = vmatpush1.bf16.msra.mxu1 %v1942_v37  ;;  %1881 = vmatprep.subr.bf16.mxu0 %v1880_v38  ;;  %v910_v37 = vld [vmem:[#allocation5 + $0xad8] sm:$0xff]  ;;  %v1608_v38 = vld [vmem:[%s2491_s1 + $0x30] sm:$0xff] }
  0xad   :  { %1945 = vmatprep.subr.bf16.mxu1 %v1944_v42  ;;  %846 = vmatprep.mubr.f32.mxu0 %v2352_v23  ;;  %v742_v42 = vld [vmem:[#allocation5 + $0x8c0] sm:$0xff]  ;;  %v1964_v45 = vpack.c.bf16 %v910_v37, %v908_v36  ;;  %v928_v36 = vld [vmem:[#allocation5 + $0xb68] sm:$0xff]  ;;  %v930_v37 = vld [vmem:[#allocation5 + $0xb78] sm:$0xff] }
  0xae   :  { %1011 = vmatprep.mubr.f32.mxu1 %v2352_v23  ;;  %693 = vperm.xlu0 %2202, %v1608_v38   ;;  %v1902_v51 = vpack.c.bf16 %v744_v43, %v742_v42  ;;  %v1918_v38 = vpack.c.bf16 %v760_v31, %v758_v30  ;;  %v764_v42 = vld [vmem:[#allocation5 + $0x970] sm:$0xff]  ;;  %v927_v43 = vld [vmem:[#allocation5 + $0xb60] sm:$0xff]  ;;  %v1984_v44 = vpack.c.bf16 %v930_v37, %v928_v36  ;;  %v1049_v37 = vld [vmem:[#allocation5 + $0xc08] sm:$0xff] }
  0xaf   :  { %1883 = vmatpush1.bf16.msra.mxu0 %v1882_v48  ;;  %v749_v48 = vld [vmem:[#allocation5 + $0x8f8] sm:$0xff]  ;;  %v1612_v30 = vld [vmem:[%s2491_s1 + $0x50] sm:$0xff] }
  0xb0   :  { %1947 = vmatpush1.bf16.msra.mxu1 %v1946_v49  ;;  %1885 = vmatprep.subr.bf16.mxu0 %v1884_v50  ;;  %v912_v49 = vld [vmem:[#allocation5 + $0xae8] sm:$0xff]  ;;  %v914_v50 = vld [vmem:[#allocation5 + $0xaf8] sm:$0xff]  ;;  %v1904_v53 = vpack.c.bf16 %v749_v48, %v747_v47  ;;  %v945_v36 = vld [vmem:[#allocation5 + $0xbf0] sm:$0xff] }
  0xb1   :  { %1949 = vmatprep.subr.bf16.mxu1 %v1948_v54  ;;  %v746_v54 = vld [vmem:[#allocation5 + $0x8e0] sm:$0xff]  ;;  %v1968_v57 = vpack.c.bf16 %v914_v50, %v912_v49  ;;  %v769_v47 = vld [vmem:[#allocation5 + $0x998] sm:$0xff]  ;;  %v932_v48 = vld [vmem:[#allocation5 + $0xb88] sm:$0xff] }
  0xb2   :  { %v1906_v0 = vpack.c.bf16 %v748_v55, %v746_v54  ;;  %v934_v49 = vld [vmem:[#allocation5 + $0xb98] sm:$0xff]  ;;  %v768_v54 = vld [vmem:[#allocation5 + $0x990] sm:$0xff]  ;;  %v931_v55 = vld [vmem:[#allocation5 + $0xb80] sm:$0xff] }
  0xb3   :  { %1887 = vmatpush1.bf16.msra.mxu0 %v1886_v61  ;;  %v753_v61 = vld [vmem:[#allocation5 + $0x918] sm:$0xff]  ;;  %v1988_v56 = vpack.c.bf16 %v934_v49, %v932_v48  ;;  %v1215_v48 = vld [vmem:[#allocation5 + $0xe10] sm:$0xff]  ;;  %v1053_v49 = vld [vmem:[#allocation5 + $0xc28] sm:$0xff] }
  0xb4   :  { %1951 = vmatpush1.bf16.msra.mxu1 %v1950_v62  ;;  %1889 = vmatprep.subr.bf16.mxu0 %v1888_v63  ;;  %v916_v62 = vld [vmem:[#allocation5 + $0xb08] sm:$0xff]  ;;  %v918_v63 = vld [vmem:[#allocation5 + $0xb18] sm:$0xff]  ;;  %v1908_v2 = vpack.c.bf16 %v753_v61, %v751_v59 }
  0xb5   :  { %1953 = vmatprep.subr.bf16.mxu1 %v1952_v3  ;;  %v750_v3 = vld [vmem:[#allocation5 + $0x900] sm:$0xff]  ;;  %v1972_v6 = vpack.c.bf16 %v918_v63, %v916_v62  ;;  %v773_v59 = vld [vmem:[#allocation5 + $0x9b8] sm:$0xff]  ;;  %v936_v61 = vld [vmem:[#allocation5 + $0xba8] sm:$0xff] }
  0xb6   :  { %v938_v62 = vld [vmem:[#allocation5 + $0xbb8] sm:$0xff] }
  0xb7   :  { %1891 = vmatpush1.bf16.msra.mxu0 %v1890_v10  ;;  %v757_v10 = vld [vmem:[#allocation5 + $0x938] sm:$0xff]  ;;  %v1992_v5 = vpack.c.bf16 %v938_v62, %v936_v61  ;;  %v1219_v61 = vld [vmem:[#allocation5 + $0xe30] sm:$0xff]  ;;  %v1057_v62 = vld [vmem:[#allocation5 + $0xc48] sm:$0xff] }
  0xb8   :  { %1955 = vmatpush1.bf16.msra.mxu1 %v1954_v12  ;;  %1893 = vmatprep.subr.bf16.mxu0 %v1892_v13  ;;  %v922_v12 = vld [vmem:[#allocation5 + $0xb38] sm:$0xff]  ;;  %v1910_v13 = vpack.c.bf16 %v752_v4, %v750_v3  ;;  %v1912_v15 = vpack.c.bf16 %v757_v10, %v755_v9  ;;  %v772_v3 = vld [vmem:[#allocation5 + $0x9b0] sm:$0xff]  ;;  %v935_v4 = vld [vmem:[#allocation5 + $0xba0] sm:$0xff] }
  0xb9   :  { %1957 = vmatprep.subr.bf16.mxu1 %v1956_v17  ;;  %v756_v17 = vld [vmem:[#allocation5 + $0x930] sm:$0xff]  ;;  %v1976_v19 = vpack.c.bf16 %v922_v12, %v920_v11  ;;  %v777_v9 = vld [vmem:[#allocation5 + $0x9d8] sm:$0xff]  ;;  %v940_v10 = vld [vmem:[#allocation5 + $0xbc8] sm:$0xff] }
  0xba   :  { %v1914_v27 = vpack.c.bf16 %v756_v17, %v754_v16  ;;  %v942_v11 = vld [vmem:[#allocation5 + $0xbd8] sm:$0xff]  ;;  %v1932_v16 = vpack.c.bf16 %v777_v9, %v775_v8  ;;  %v774_v17 = vld [vmem:[#allocation5 + $0x9c0] sm:$0xff] }
  0xbb   :  { %1895 = vmatpush1.bf16.msra.mxu0 %v1894_v26  ;;  %v926_v26 = vld [vmem:[#allocation5 + $0xb58] sm:$0xff]  ;;  %v1221_v8 = vld [vmem:[#allocation5 + $0xe40] sm:$0xff] }
  0xbc   :  { %1959 = vmatpush1.bf16.msra.mxu1 %v1958_v28  ;;  %1897 = vmatprep.subr.bf16.mxu0 %v1896_v29  ;;  %v1978_v28 = vpack.c.bf16 %v921_v21, %v919_v18  ;;  %v1916_v29 = vpack.c.bf16 %v761_v24, %v759_v22  ;;  %v776_v18 = vld [vmem:[#allocation5 + $0x9d0] sm:$0xff]  ;;  %v1996_v21 = vpack.c.bf16 %v942_v11, %v940_v10  ;;  %v779_v24 = vld [vmem:[#allocation5 + $0x9e8] sm:$0xff] }
  0xbd   :  { %1961 = vmatprep.subr.bf16.mxu1 %v1960_v33  ;;  %v1980_v33 = vpack.c.bf16 %v926_v26, %v924_v25  ;;  %v941_v22 = vld [vmem:[#allocation5 + $0xbd0] sm:$0xff]  ;;  %v781_v25 = vld [vmem:[#allocation5 + $0x9f8] sm:$0xff]  ;;  %v944_v26 = vld [vmem:[#allocation5 + $0xbe8] sm:$0xff] }
  0xbe   :  { %v1223_v10 = vld [vmem:[#allocation5 + $0xe50] sm:$0xff]  ;;  %v1061_v11 = vld [vmem:[#allocation5 + $0xc68] sm:$0xff] }
  0xbf   :  { %1899 = vmatpush1.bf16.msra.mxu0 %v1898_v39  ;;  %v1982_v39 = vpack.c.bf16 %v925_v20, %v923_v32  ;;  %v1936_v32 = vpack.c.bf16 %v781_v25, %v779_v24  ;;  %v780_v20 = vld [vmem:[#allocation5 + $0x9f0] sm:$0xff]  ;;  %v1065_v25 = vld [vmem:[#allocation5 + $0xc88] sm:$0xff] }
  0xc0   :  { %1963 = vmatpush1.bf16.msra.mxu1 %v1962_v40  ;;  %1901 = vmatprep.subr.bf16.mxu0 %v1900_v41  ;;  %v1920_v40 = vpack.c.bf16 %v765_v35, %v763_v34  ;;  %v762_v41 = vld [vmem:[#allocation5 + $0x960] sm:$0xff]  ;;  %v1227_v24 = vld [vmem:[#allocation5 + $0xe70] sm:$0xff] }
  0xc1   :  { %1965 = vmatprep.subr.bf16.mxu1 %v1964_v45  ;;  %v929_v45 = vld [vmem:[#allocation5 + $0xb70] sm:$0xff]  ;;  %v1922_v50 = vpack.c.bf16 %v764_v42, %v762_v41  ;;  %v943_v34 = vld [vmem:[#allocation5 + $0xbe0] sm:$0xff] }
  0xc2   :  { %v2002_v42 = vpack.c.bf16 %v945_v36, %v943_v34  ;;  %v1069_v36 = vld [vmem:[#allocation5 + $0xca8] sm:$0xff] }
  0xc3   :  { %1903 = vmatpush1.bf16.msra.mxu0 %v1902_v51  ;;  %v1986_v51 = vpack.c.bf16 %v929_v45, %v927_v43  ;;  %v1050_v45 = vld [vmem:[#allocation5 + $0xc10] sm:$0xff] }
  0xc4   :  { %1967 = vmatpush1.bf16.msra.mxu1 %v1966_v52  ;;  %1905 = vmatprep.subr.bf16.mxu0 %v1904_v53  ;;  %v1924_v52 = vpack.c.bf16 %v769_v47, %v767_v46  ;;  %v766_v53 = vld [vmem:[#allocation5 + $0x980] sm:$0xff] }
  0xc5   :  { %1969 = vmatprep.subr.bf16.mxu1 %v1968_v57  ;;  %v933_v57 = vld [vmem:[#allocation5 + $0xb90] sm:$0xff]  ;;  %v1926_v63 = vpack.c.bf16 %v768_v54, %v766_v53  ;;  %v1213_v46 = vld [vmem:[#allocation5 + $0xe00] sm:$0xff] }
  0xc6   :  { %v2070_v54 = vpack.c.bf16 %v1215_v48, %v1213_v46  ;;  %v1073_v48 = vld [vmem:[#allocation5 + $0xcc8] sm:$0xff] }
  0xc7   :  { %1907 = vmatpush1.bf16.msra.mxu0 %v1906_v0  ;;  %v1990_v0 = vpack.c.bf16 %v933_v57, %v931_v55  ;;  %v1054_v57 = vld [vmem:[#allocation5 + $0xc30] sm:$0xff] }
  0xc8   :  { %1971 = vmatpush1.bf16.msra.mxu1 %v1970_v1  ;;  %1909 = vmatprep.subr.bf16.mxu0 %v1908_v2  ;;  %v1928_v1 = vpack.c.bf16 %v773_v59, %v771_v58  ;;  %v770_v2 = vld [vmem:[#allocation5 + $0x9a0] sm:$0xff] }
  0xc9   :  { %1973 = vmatprep.subr.bf16.mxu1 %v1972_v6  ;;  %v937_v6 = vld [vmem:[#allocation5 + $0xbb0] sm:$0xff]  ;;  %v1930_v12 = vpack.c.bf16 %v772_v3, %v770_v2  ;;  %v1217_v58 = vld [vmem:[#allocation5 + $0xe20] sm:$0xff] }
  0xca   :  { %v2074_v3 = vpack.c.bf16 %v1219_v61, %v1217_v58  ;;  %v1239_v58 = vld [vmem:[#allocation5 + $0xed0] sm:$0xff]  ;;  %v1077_v61 = vld [vmem:[#allocation5 + $0xce8] sm:$0xff] }
  0xcb   :  { %1911 = vmatpush1.bf16.msra.mxu0 %v1910_v13  ;;  %v1611_v13 = vld [vmem:[%s2491_s1 + $0x48] sm:$0xff] }
  0xcc   :  { %1975 = vmatpush1.bf16.msra.mxu1 %v1974_v14  ;;  %1913 = vmatprep.subr.bf16.mxu0 %v1912_v15  ;;  %v1610_v14 = vld [vmem:[%s2491_s1 + $0x40] sm:$0xff]  ;;  %v1994_v15 = vpack.c.bf16 %v937_v6, %v935_v4  ;;  %v1058_v6 = vld [vmem:[#allocation5 + $0xc50] sm:$0xff] }
  0xcd   :  { %1977 = vmatprep.subr.bf16.mxu1 %v1976_v19  ;;  %v939_v19 = vld [vmem:[#allocation5 + $0xbc0] sm:$0xff]  ;;  %863 = vperm.xlu1 %2203, %v1611_v13   ;;  %v1226_v13 = vld [vmem:[#allocation5 + $0xe68] sm:$0xff] }
  0xce   :  { %858 = vperm.xlu0 %2202, %v1610_v14   ;;  %v1998_v31 = vpack.c.bf16 %v941_v22, %v939_v19  ;;  %v1228_v14 = vld [vmem:[#allocation5 + $0xe78] sm:$0xff]  ;;  %v1062_v19 = vld [vmem:[#allocation5 + $0xc70] sm:$0xff] }
  0xcf   :  { %1915 = vmatpush1.bf16.msra.mxu0 %v1914_v27  ;;  %v946_v27 = vld [vmem:[#allocation5 + $0xbf8] sm:$0xff]  ;;  %v2080_v22 = vpack.c.bf16 %v1228_v14, %v1226_v13  ;;  %v1246_v14 = vld [vmem:[#allocation5 + $0xf08] sm:$0xff] }
  0xd0   :  { %1979 = vmatpush1.bf16.msra.mxu1 %v1978_v28  ;;  %1917 = vmatprep.subr.bf16.mxu0 %v1916_v29  ;;  %v1613_v28 = vld [vmem:[%s2491_s1 + $0x58] sm:$0xff]  ;;  %v1934_v29 = vpack.c.bf16 %v776_v18, %v774_v17  ;;  %v2000_v35 = vpack.c.bf16 %v946_v27, %v944_v26  ;;  %v1060_v18 = vld [vmem:[#allocation5 + $0xc60] sm:$0xff]  ;;  %v1230_v27 = vld [vmem:[#allocation5 + $0xe88] sm:$0xff] }
  0xd1   :  { %1981 = vmatprep.subr.bf16.mxu1 %v1980_v33  ;;  %v778_v33 = vld [vmem:[#allocation5 + $0x9e0] sm:$0xff]  ;;  %1028 = vperm.xlu1 %2203, %v1613_v28   ;;  %v1067_v26 = vld [vmem:[#allocation5 + $0xc98] sm:$0xff] }
  0xd2   :  { %1023 = vperm.xlu0 %2202, %v1612_v30   ;;  %v1938_v41 = vpack.c.bf16 %v780_v20, %v778_v33  ;;  %v1232_v28 = vld [vmem:[#allocation5 + $0xe98] sm:$0xff]  ;;  %v1066_v33 = vld [vmem:[#allocation5 + $0xc90] sm:$0xff]  ;;  %v1229_v20 = vld [vmem:[#allocation5 + $0xe80] sm:$0xff] }
  0xd3   :  { %1919 = vmatpush1.bf16.msra.mxu0 %v1918_v38  ;;  %v1051_v38 = vld [vmem:[#allocation5 + $0xc18] sm:$0xff]  ;;  %v2084_v34 = vpack.c.bf16 %v1232_v28, %v1230_v27  ;;  %v1085_v28 = vld [vmem:[#allocation5 + $0xd28] sm:$0xff] }
  0xd4   :  { %1983 = vmatpush1.bf16.msra.mxu1 %v1982_v39  ;;  %1921 = vmatprep.subr.bf16.mxu0 %v1920_v40  ;;  %v1214_v39 = vld [vmem:[#allocation5 + $0xe08] sm:$0xff]  ;;  %v1216_v40 = vld [vmem:[#allocation5 + $0xe18] sm:$0xff]  ;;  %v2004_v43 = vpack.c.bf16 %v1051_v38, %v1049_v37 }
  0xd5   :  { %1985 = vmatprep.subr.bf16.mxu1 %v1984_v44  ;;  %v1048_v44 = vld [vmem:[#allocation5 + $0xc00] sm:$0xff]  ;;  %v2068_v47 = vpack.c.bf16 %v1216_v40, %v1214_v39  ;;  %v1071_v37 = vld [vmem:[#allocation5 + $0xcb8] sm:$0xff]  ;;  %v1234_v38 = vld [vmem:[#allocation5 + $0xea8] sm:$0xff] }
  0xd6   :  { %v2006_v53 = vpack.c.bf16 %v1050_v45, %v1048_v44  ;;  %v1236_v39 = vld [vmem:[#allocation5 + $0xeb8] sm:$0xff]  ;;  %v1070_v44 = vld [vmem:[#allocation5 + $0xcb0] sm:$0xff]  ;;  %v1233_v45 = vld [vmem:[#allocation5 + $0xea0] sm:$0xff] }
  0xd7   :  { %1923 = vmatpush1.bf16.msra.mxu0 %v1922_v50  ;;  %v1055_v50 = vld [vmem:[#allocation5 + $0xc38] sm:$0xff]  ;;  %v2088_v46 = vpack.c.bf16 %v1236_v39, %v1234_v38  ;;  %v1249_v38 = vld [vmem:[#allocation5 + $0xf20] sm:$0xff] }
  0xd8   :  { %1987 = vmatpush1.bf16.msra.mxu1 %v1986_v51  ;;  %1925 = vmatprep.subr.bf16.mxu0 %v1924_v52  ;;  %v1218_v51 = vld [vmem:[#allocation5 + $0xe28] sm:$0xff]  ;;  %v1220_v52 = vld [vmem:[#allocation5 + $0xe38] sm:$0xff]  ;;  %v2008_v55 = vpack.c.bf16 %v1055_v50, %v1053_v49 }
  0xd9   :  { %1989 = vmatprep.subr.bf16.mxu1 %v1988_v56  ;;  %v1052_v56 = vld [vmem:[#allocation5 + $0xc20] sm:$0xff]  ;;  %v2072_v59 = vpack.c.bf16 %v1220_v52, %v1218_v51  ;;  %v1075_v49 = vld [vmem:[#allocation5 + $0xcd8] sm:$0xff]  ;;  %v1238_v50 = vld [vmem:[#allocation5 + $0xec8] sm:$0xff] }
  0xda   :  { %v2010_v2 = vpack.c.bf16 %v1054_v57, %v1052_v56  ;;  %v1240_v51 = vld [vmem:[#allocation5 + $0xed8] sm:$0xff]  ;;  %v1074_v56 = vld [vmem:[#allocation5 + $0xcd0] sm:$0xff]  ;;  %v1237_v57 = vld [vmem:[#allocation5 + $0xec0] sm:$0xff] }
  0xdb   :  { %1927 = vmatpush1.bf16.msra.mxu0 %v1926_v63  ;;  %v1059_v63 = vld [vmem:[#allocation5 + $0xc58] sm:$0xff]  ;;  %v1543_v39 = vld [vmem:[%s2493_s3 + $0x8] sm:$0xff] }
  0xdc   :  { %1991 = vmatpush1.bf16.msra.mxu1 %v1990_v0  ;;  %1929 = vmatprep.subr.bf16.mxu0 %v1928_v1  ;;  %v1222_v0 = vld [vmem:[#allocation5 + $0xe48] sm:$0xff]  ;;  %v1224_v1 = vld [vmem:[#allocation5 + $0xe58] sm:$0xff]  ;;  %v2012_v4 = vpack.c.bf16 %v1059_v63, %v1057_v62 }
  0xdd   :  { %1993 = vmatprep.subr.bf16.mxu1 %v1992_v5  ;;  %v1056_v5 = vld [vmem:[#allocation5 + $0xc40] sm:$0xff]  ;;  %v2076_v9 = vpack.c.bf16 %v1224_v1, %v1222_v0  ;;  %v1079_v62 = vld [vmem:[#allocation5 + $0xcf8] sm:$0xff]  ;;  %v1242_v63 = vld [vmem:[#allocation5 + $0xee8] sm:$0xff] }
  0xde   :  { %v1244_v0 = vld [vmem:[#allocation5 + $0xef8] sm:$0xff]  ;;  %v1615_v1 = vld [vmem:[%s2491_s1 + $0x68] sm:$0xff] }
  0xdf   :  { %1931 = vmatpush1.bf16.msra.mxu0 %v1930_v12  ;;  %v1063_v12 = vld [vmem:[#allocation5 + $0xc78] sm:$0xff]  ;;  %1193 = vperm.xlu1 %2203, %v1615_v1   ;;  %v1092_v1 = vld [vmem:[#allocation5 + $0xd60] sm:$0xff] }
  0xe0   :  { %1995 = vmatpush1.bf16.msra.mxu1 %v1994_v15  ;;  %1933 = vmatprep.subr.bf16.mxu0 %v1932_v16  ;;  %v2014_v15 = vpack.c.bf16 %v1058_v6, %v1056_v5  ;;  %v2078_v16 = vpack.c.bf16 %v1223_v10, %v1221_v8  ;;  %v2016_v17 = vpack.c.bf16 %v1063_v12, %v1061_v11  ;;  %v1078_v8 = vld [vmem:[#allocation5 + $0xcf0] sm:$0xff]  ;;  %v1081_v12 = vld [vmem:[#allocation5 + $0xd08] sm:$0xff]  ;;  %v1083_v13 = vld [vmem:[#allocation5 + $0xd18] sm:$0xff] }
  0xe1   :  { %1997 = vmatprep.subr.bf16.mxu1 %v1996_v21  ;;  %v1225_v21 = vld [vmem:[#allocation5 + $0xe60] sm:$0xff]  ;;  %v2094_v5 = vpack.c.bf16 %v1239_v58, %v1237_v57  ;;  %v2032_v6 = vpack.c.bf16 %v1079_v62, %v1077_v61  ;;  %v1243_v10 = vld [vmem:[#allocation5 + $0xef0] sm:$0xff]  ;;  %v2096_v11 = vpack.c.bf16 %v1244_v0, %v1242_v63  ;;  %v1095_v57 = vld [vmem:[#allocation5 + $0xd78] sm:$0xff] }
  0xe2   :  { %v2082_v30 = vpack.c.bf16 %v1227_v24, %v1225_v21  ;;  %v1082_v24 = vld [vmem:[#allocation5 + $0xd10] sm:$0xff]  ;;  %v1258_v58 = vld [vmem:[#allocation5 + $0xf68] sm:$0xff]  ;;  %v1558_v61 = vld [vmem:[%s2494_s4] sm:$0xff] }
  0xe3   :  { %1935 = vmatpush1.bf16.msra.mxu0 %v1934_v29  ;;  %v2018_v29 = vpack.c.bf16 %v1062_v19, %v1060_v18  ;;  %v1080_v19 = vld [vmem:[#allocation5 + $0xd00] sm:$0xff] }
  0xe4   :  { %1999 = vmatpush1.bf16.msra.mxu1 %v1998_v31  ;;  %1937 = vmatprep.subr.bf16.mxu0 %v1936_v32  ;;  %v2020_v31 = vpack.c.bf16 %v1067_v26, %v1065_v25  ;;  %v1064_v32 = vld [vmem:[#allocation5 + $0xc80] sm:$0xff]  ;;  %v1247_v26 = vld [vmem:[#allocation5 + $0xf10] sm:$0xff] }
  0xe5   :  { %2001 = vmatprep.subr.bf16.mxu1 %v2000_v35  ;;  %v1231_v35 = vld [vmem:[#allocation5 + $0xe90] sm:$0xff]  ;;  %v2022_v40 = vpack.c.bf16 %v1066_v33, %v1064_v32  ;;  %v1245_v25 = vld [vmem:[#allocation5 + $0xf00] sm:$0xff]  ;;  %v1252_v32 = vld [vmem:[#allocation5 + $0xf38] sm:$0xff] }
  0xe6   :  { %v1618_v33 = vld [vmem:[%s2491_s1 + $0x80] sm:$0xff] }
  0xe7   :  { %1939 = vmatpush1.bf16.msra.mxu0 %v1938_v41  ;;  %v2086_v41 = vpack.c.bf16 %v1231_v35, %v1229_v20  ;;  %v2038_v20 = vpack.c.bf16 %v1082_v24, %v1080_v19  ;;  %v2102_v35 = vpack.c.bf16 %v1247_v26, %v1245_v25  ;;  %v1101_v19 = vld [vmem:[#allocation5 + $0xda8] sm:$0xff]  ;;  %v1268_v24 = vld [vmem:[#allocation5 + $0xfb8] sm:$0xff] }
  0xe8   :  { %2003 = vmatpush1.bf16.msra.mxu1 %v2002_v42  ;;  %2005 = vmatprep.subr.bf16.mxu0 %v2004_v43  ;;  %v2024_v42 = vpack.c.bf16 %v1071_v37, %v1069_v36  ;;  %v1068_v43 = vld [vmem:[#allocation5 + $0xca0] sm:$0xff]  ;;  %v1086_v37 = vld [vmem:[#allocation5 + $0xd30] sm:$0xff] }
  0xe9   :  { %2069 = vmatprep.subr.bf16.mxu1 %v2068_v47  ;;  %v1235_v47 = vld [vmem:[#allocation5 + $0xeb0] sm:$0xff]  ;;  %v2026_v52 = vpack.c.bf16 %v1070_v44, %v1068_v43  ;;  %v1091_v43 = vld [vmem:[#allocation5 + $0xd58] sm:$0xff]  ;;  %v1254_v44 = vld [vmem:[#allocation5 + $0xf48] sm:$0xff] }
  0xea   :  { %847 = vmatmul.mubr.f32.vlgmr.msra.gmra.mrb[4].mxu0 %v2361_v60 }
  0xeb   :  { %2007 = vmatpush1.bf16.msra.mxu0 %v2006_v53  ;;  %1012 = vmatmul.mubr.f32.vlgmr.msra.gmra.mrb[4].mxu1 %v2361_v60  ;;  %v1072_v53 = vld [vmem:[#allocation5 + $0xcc0] sm:$0xff] }
  0xec   :  { %2071 = vmatpush1.bf16.msra.mxu1 %v2070_v54  ;;  %2009 = vmatprep.subr.bf16.mxu0 %v2008_v55  ;;  %v2090_v54 = vpack.c.bf16 %v1235_v47, %v1233_v45  ;;  %v2028_v55 = vpack.c.bf16 %v1075_v49, %v1073_v48  ;;  %v1256_v45 = vld [vmem:[#allocation5 + $0xf58] sm:$0xff]  ;;  %v1088_v48 = vld [vmem:[#allocation5 + $0xd40] sm:$0xff] }
  0xed   :  { %2073 = vmatprep.subr.bf16.mxu1 %v2072_v59  ;;  %1176 = vmatprep.mubr.f32.mxu0 %v2352_v23  ;;  %v2092_v59 = vpack.c.bf16 %v1240_v51, %v1238_v50  ;;  %v1090_v51 = vld [vmem:[#allocation5 + $0xd50] sm:$0xff] }
  0xee   :  { %1341 = vmatprep.mubr.f32.mxu1 %v2352_v23  ;;  %v2046_v62 = vpack.c.bf16 %v1090_v51, %v1088_v48  ;;  %v1108_v51 = vld [vmem:[#allocation5 + $0xde0] sm:$0xff] }
  0xef   :  { %2011 = vmatpush1.bf16.msra.mxu0 %v2010_v2  ;;  %v1614_v2 = vld [vmem:[%s2491_s1 + $0x60] sm:$0xff] }
  0xf0   :  { %2075 = vmatpush1.bf16.msra.mxu1 %v2074_v3  ;;  %2013 = vmatprep.subr.bf16.mxu0 %v2012_v4  ;;  %v2030_v3 = vpack.c.bf16 %v1074_v56, %v1072_v53  ;;  %v1076_v4 = vld [vmem:[#allocation5 + $0xce0] sm:$0xff]  ;;  %v1093_v56 = vld [vmem:[#allocation5 + $0xd68] sm:$0xff] }
  0xf1   :  { %2077 = vmatprep.subr.bf16.mxu1 %v2076_v9  ;;  %v1241_v9 = vld [vmem:[#allocation5 + $0xee0] sm:$0xff]  ;;  %1188 = vperm.xlu0 %2202, %v1614_v2   ;;  %v2034_v18 = vpack.c.bf16 %v1078_v8, %v1076_v4  ;;  %v2048_v0 = vpack.c.bf16 %v1095_v57, %v1093_v56  ;;  %v1094_v2 = vld [vmem:[#allocation5 + $0xd70] sm:$0xff]  ;;  %v1099_v8 = vld [vmem:[#allocation5 + $0xd98] sm:$0xff] }
  0xf2   :  { %v2098_v21 = vpack.c.bf16 %v1243_v10, %v1241_v9  ;;  %v1559_v53 = vld [vmem:[%s2494_s4 + $0x8] sm:$0xff]  ;;  %v1264_v10 = vld [vmem:[#allocation5 + $0xf98] sm:$0xff]  ;;  %s2281_s4 = smov [#allocation7]  }
  0xf3   :  { %2015 = vmatpush1.bf16.msra.mxu0 %v2014_v15  ;;  %v1248_v15 = vld [vmem:[#allocation5 + $0xf18] sm:$0xff]  ;;  %v1262_v9 = vld [vmem:[#allocation5 + $0xf88] sm:$0xff]  ;;  %s1591_s9 = sshll.u32 %s2281_s4, 4  ;;  %s1592_s9 = int_to_ptr.vmem [resolvable:$true] %s1591_s9 }
  0xf4   :  { %2079 = vmatpush1.bf16.msra.mxu1 %v2078_v16  ;;  %2017 = vmatprep.subr.bf16.mxu0 %v2016_v17  ;;  %v1617_v16 = vld [vmem:[%s2491_s1 + $0x78] sm:$0xff]  ;;  %v1616_v17 = vld [vmem:[%s2491_s1 + $0x70] sm:$0xff]  ;;  %v2100_v27 = vpack.c.bf16 %v1248_v15, %v1246_v14  ;;  %v1096_v14 = vld [vmem:[#allocation5 + $0xd80] sm:$0xff]  ;;  %s2248_s10 = scalar_lea.vmem %s1592_s9, 512  ;;  %p2253_p3 = scmp.lt.s32.totalorder %s1592_s9, %s1592_s9 }
  0xf5   :  { %2081 = vmatprep.subr.bf16.mxu1 %v2080_v22  ;;  %1358 = vperm.xlu1 %2203, %v1617_v16   ;;  %v2036_v22 = vpack.c.bf16 %v1083_v13, %v1081_v12  ;;  %v1098_v15 = vld [vmem:[#allocation5 + $0xd90] sm:$0xff]  ;;  %v1261_v16 = vld [vmem:[#allocation5 + $0xf80] sm:$0xff]  ;;  %v1379_v56 = vld [vmem:[#allocation5 + $0x1008] sm:$0xff]  ;;  %p2249_p2 = scmp.ne.s32.totalorder %s1592_s9, %s2248_s10  ;;  %p2254_p4 = scmp.lt.s32.totalorder %s2248_s10, %s2248_s10 }
  0xf6   :  { %1353 = vperm.xlu0 %2202, %v1616_v17   ;;  %v2116_v17 = vpack.c.bf16 %v1264_v10, %v1262_v9  ;;  %v2054_v25 = vpack.c.bf16 %v1098_v15, %v1096_v14  ;;  %v1381_v57 = vld [vmem:[#allocation5 + $0x1018] sm:$0xff] }
  0xf7   :  { %2019 = vmatpush1.bf16.msra.mxu0 %v2018_v29  ;;  %v1087_v29 = vld [vmem:[#allocation5 + $0xd38] sm:$0xff]  ;;  %p2255_p5 = por %p2254_p4, %p2253_p3 }
  0xf8   :  { %2083 = vmatpush1.bf16.msra.mxu1 %v2082_v30  ;;  %2021 = vmatprep.subr.bf16.mxu0 %v2020_v31  ;;  %v1619_v30 = vld [vmem:[%s2491_s1 + $0x88] sm:$0xff]  ;;  %v2040_v36 = vpack.c.bf16 %v1087_v29, %v1085_v28  ;;  %v1102_v29 = vld [vmem:[#allocation5 + $0xdb0] sm:$0xff]  ;;  %v1393_v14 = vld [vmem:[#allocation5 + $0x1078] sm:$0xff] }
  0xf9   :  { %2085 = vmatprep.subr.bf16.mxu1 %v2084_v34  ;;  %v1250_v31 = vld [vmem:[#allocation5 + $0xf28] sm:$0xff]  ;;  %v1084_v34 = vld [vmem:[#allocation5 + $0xd20] sm:$0xff]  ;;  %1523 = vperm.xlu1 %2203, %v1619_v30   ;;  %p2256_p6 = pnand %p2255_p5, %p2249_p2 }
  0xfa   :  { %1518 = vperm.xlu0 %2202, %v1618_v33   ;;  %v2042_v47 = vpack.c.bf16 %v1086_v37, %v1084_v34  ;;  %v1100_v28 = vld [vmem:[#allocation5 + $0xda0] sm:$0xff]  ;;  %v1105_v33 = vld [vmem:[#allocation5 + $0xdc8] sm:$0xff] }
  0xfb   :  { %2023 = vmatpush1.bf16.msra.mxu0 %v2022_v40  ;;  %v2104_v40 = vpack.c.bf16 %v1252_v32, %v1250_v31  ;;  %v1265_v30 = vld [vmem:[#allocation5 + $0xfa0] sm:$0xff]  ;;  %v1267_v32 = vld [vmem:[#allocation5 + $0xfb0] sm:$0xff]  ;;  %v1270_v34 = vld [vmem:[#allocation5 + $0xfc8] sm:$0xff] }
  0xfc   :  { %2087 = vmatpush1.bf16.msra.mxu1 %v2086_v41  ;;  %2025 = vmatprep.subr.bf16.mxu0 %v2024_v42  ;;  %v1251_v41 = vld [vmem:[#allocation5 + $0xf30] sm:$0xff]  ;;  %v1089_v42 = vld [vmem:[#allocation5 + $0xd48] sm:$0xff]  ;;  %v2122_v37 = vpack.c.bf16 %v1267_v32, %v1265_v30  ;;  %v199_v30 = vpop.permute.xlu0 %198  ;;  %v1398_v32 = vld [vmem:[#allocation5 + $0x10a0] sm:$0xff] }
  0xfd   :  { %2089 = vmatprep.subr.bf16.mxu1 %v2088_v46  ;;  %v1542_v46 = vld [vmem:[%s2493_s3] sm:$0xff]  ;;  %1551 = vperm.xlu1 %2203, %v1543_v39   ;;  %v2106_v49 = vpack.c.bf16 %v1251_v41, %v1249_v38  ;;  %v2044_v50 = vpack.c.bf16 %v1091_v43, %v1089_v42  ;;  %v1271_v43 = vld [vmem:[#allocation5 + $0xfd0] sm:$0xff] }
  0xfe   :  { %1546 = vperm.xlu0 %2202, %v1542_v46   ;;  %v1104_v39 = vld [vmem:[#allocation5 + $0xdc0] sm:$0xff]  ;;  %v1274_v46 = vld [vmem:[#allocation5 + $0xfe8] sm:$0xff] }
  0xff   :  { %2027 = vmatpush1.bf16.msra.mxu0 %v2026_v52  ;;  %v1253_v52 = vld [vmem:[#allocation5 + $0xf40] sm:$0xff] }
 0x100   :  { %2091 = vmatpush1.bf16.msra.mxu1 %v2090_v54  ;;  %2029 = vmatprep.subr.bf16.mxu0 %v2028_v55  ;;  %v2108_v54 = vpack.c.bf16 %v1256_v45, %v1254_v44  ;;  %v1255_v55 = vld [vmem:[#allocation5 + $0xf50] sm:$0xff]  ;;  %v1269_v41 = vld [vmem:[#allocation5 + $0xfc0] sm:$0xff]  ;;  %v1109_v44 = vld [vmem:[#allocation5 + $0xde8] sm:$0xff] }
 0x101   :  { %2093 = vmatprep.subr.bf16.mxu1 %v2092_v59  ;;  %v1260_v59 = vld [vmem:[#allocation5 + $0xf78] sm:$0xff]  ;;  %1567 = vperm.xlu1 %2203, %v1559_v53   ;;  %v2110_v63 = vpack.c.bf16 %v1255_v55, %v1253_v52  ;;  %v1110_v52 = vld [vmem:[#allocation5 + $0xdf0] sm:$0xff]  ;;  %v1273_v53 = vld [vmem:[#allocation5 + $0xfe0] sm:$0xff] }
 0x102   :  { %v2112_v4 = vpack.c.bf16 %v1260_v59, %v1258_v58  ;;  %1562 = vperm.xlu0 %2202, %v1558_v61   ;;  %v1111_v45 = vld [vmem:[#allocation5 + $0xdf8] sm:$0xff]  ;;  %v1275_v55 = vld [vmem:[#allocation5 + $0xff0] sm:$0xff]  ;;  %v2066_v58 = vpack.c.bf16 %v1110_v52, %v1108_v51  ;;  %v2132_v61 = vpack.c.bf16 %v1381_v57, %v1379_v56 }
 0x103   :  { %2031 = vmatpush1.bf16.msra.mxu0 %v2030_v3  ;;  %v1257_v3 = vld [vmem:[#allocation5 + $0xf60] sm:$0xff]  ;;  %v2130_v59 = vpack.c.bf16 %v1275_v55, %v1273_v53  ;;  %v1408_v56 = vld [vmem:[#allocation5 + $0x10f0] sm:$0xff] }
 0x104   :  { %2095 = vmatpush1.bf16.msra.mxu1 %v2094_v5  ;;  %2033 = vmatprep.subr.bf16.mxu0 %v2032_v6  ;;  %v1259_v5 = vld [vmem:[#allocation5 + $0xf70] sm:$0xff]  ;;  %v1097_v6 = vld [vmem:[#allocation5 + $0xd88] sm:$0xff]  ;;  %v1406_v55 = vld [vmem:[#allocation5 + $0x10e0] sm:$0xff] }
 0x105   :  { %2097 = vmatprep.subr.bf16.mxu1 %v2096_v11  ;;  %v2050_v11 = vpack.c.bf16 %v1094_v2, %v1092_v1  ;;  %v2114_v12 = vpack.c.bf16 %v1259_v5, %v1257_v3  ;;  %v2052_v13 = vpack.c.bf16 %v1099_v8, %v1097_v6  ;;  %v1385_v1 = vld [vmem:[#allocation5 + $0x1038] sm:$0xff]  ;;  %v1384_v5 = vld [vmem:[#allocation5 + $0x1030] sm:$0xff]  ;;  %v1387_v6 = vld [vmem:[#allocation5 + $0x1048] sm:$0xff] }
 0x106   :  { %v1389_v8 = vld [vmem:[#allocation5 + $0x1058] sm:$0xff] }
 0x107   :  { %2035 = vmatpush1.bf16.msra.mxu0 %v2034_v18  ;;  %v1263_v18 = vld [vmem:[#allocation5 + $0xf90] sm:$0xff]  ;;  %v2140_v10 = vpack.c.bf16 %v1389_v8, %v1387_v6 }
 0x108   :  { %2099 = vmatpush1.bf16.msra.mxu1 %v2098_v21  ;;  %2037 = vmatprep.subr.bf16.mxu0 %v2036_v22  ;;  %v1103_v21 = vld [vmem:[#allocation5 + $0xdb8] sm:$0xff]  ;;  %v1266_v22 = vld [vmem:[#allocation5 + $0xfa8] sm:$0xff]  ;;  %v2118_v26 = vpack.c.bf16 %v1263_v18, %v1261_v16  ;;  %v1392_v18 = vld [vmem:[#allocation5 + $0x1070] sm:$0xff] }
 0x109   :  { %2101 = vmatprep.subr.bf16.mxu1 %v2100_v27  ;;  %v2056_v27 = vpack.c.bf16 %v1103_v21, %v1101_v19  ;;  %v2120_v31 = vpack.c.bf16 %v1268_v24, %v1266_v22  ;;  %v1395_v19 = vld [vmem:[#allocation5 + $0x1088] sm:$0xff]  ;;  %v1397_v21 = vld [vmem:[#allocation5 + $0x1098] sm:$0xff] }
 0x10a   :  { %v2148_v24 = vpack.c.bf16 %v1397_v21, %v1395_v19 }
 0x10b   :  { %2039 = vmatpush1.bf16.msra.mxu0 %v2038_v20  ;;  %v1107_v20 = vld [vmem:[#allocation5 + $0xdd8] sm:$0xff] }
 0x10c   :  { %2103 = vmatpush1.bf16.msra.mxu1 %v2102_v35  ;;  %2041 = vmatprep.subr.bf16.mxu0 %v2040_v36  ;;  %v1272_v35 = vld [vmem:[#allocation5 + $0xfd8] sm:$0xff]  ;;  %v2058_v36 = vpack.c.bf16 %v1102_v29, %v1100_v28  ;;  %v2060_v38 = vpack.c.bf16 %v1107_v20, %v1105_v33  ;;  %v364_v29 = vpop.permute.xlu1 %363  ;;  %v1400_v33 = vld [vmem:[#allocation5 + $0x10b0] sm:$0xff]  ;;  %v1403_v20 = vld [vmem:[#allocation5 + $0x10c8] sm:$0xff] }
 0x10d   :  { %2105 = vmatprep.subr.bf16.mxu1 %v2104_v40  ;;  %v1106_v40 = vld [vmem:[#allocation5 + $0xdd0] sm:$0xff]  ;;  %v2124_v42 = vpack.c.bf16 %v1272_v35, %v1270_v34  ;;  %v1401_v28 = vld [vmem:[#allocation5 + $0x10b8] sm:$0xff]  ;;  %v2154_v35 = vpack.c.bf16 %v1400_v33, %v1398_v32 }
 0x10e   :  { %v2062_v48 = vpack.c.bf16 %v1106_v40, %v1104_v39  ;;  %v1405_v34 = vld [vmem:[#allocation5 + $0x10d8] sm:$0xff]  ;;  %v1404_v39 = vld [vmem:[#allocation5 + $0x10d0] sm:$0xff] }
 0x10f   :  { %2043 = vmatpush1.bf16.msra.mxu0 %v2042_v47  ;;  %v1276_v47 = vld [vmem:[#allocation5 + $0xff8] sm:$0xff] }
 0x110   :  { %2107 = vmatpush1.bf16.msra.mxu1 %v2106_v49  ;;  %2045 = vmatprep.subr.bf16.mxu0 %v2044_v50  ;;  %v2126_v49 = vpack.c.bf16 %v1271_v43, %v1269_v41  ;;  %v2064_v50 = vpack.c.bf16 %v1111_v45, %v1109_v44  ;;  %v204_v41 = vpop.permute.xlu0 %203  ;;  %v1409_v43 = vld [vmem:[#allocation5 + $0x10f8] sm:$0xff] }
 0x111   :  { %2109 = vmatprep.subr.bf16.mxu1 %v2108_v54  ;;  %v2128_v54 = vpack.c.bf16 %v1276_v47, %v1274_v46 }
 0x113   :  { %2047 = vmatpush1.bf16.msra.mxu0 %v2046_v62  ;;  %v1378_v62 = vld [vmem:[#allocation5 + $0x1000] sm:$0xff] }
 0x114   :  { %2111 = vmatpush1.bf16.msra.mxu1 %v2110_v63  ;;  %2049 = vmatprep.subr.bf16.mxu0 %v2048_v0  ;;  %v1380_v63 = vld [vmem:[#allocation5 + $0x1010] sm:$0xff]  ;;  %v1383_v0 = vld [vmem:[#allocation5 + $0x1028] sm:$0xff] }
 0x115   :  { %2113 = vmatprep.subr.bf16.mxu1 %v2112_v4  ;;  %v2134_v2 = vpack.c.bf16 %v1380_v63, %v1378_v62  ;;  %v2136_v3 = vpack.c.bf16 %v1385_v1, %v1383_v0  ;;  %v1382_v4 = vld [vmem:[#allocation5 + $0x1020] sm:$0xff]  ;;  %v1411_v62 = vld [vmem:[#allocation5 + $0x1108] sm:$0xff]  ;;  %v1413_v63 = vld [vmem:[#allocation5 + $0x1118] sm:$0xff] }
 0x116   :  { %v2138_v9 = vpack.c.bf16 %v1384_v5, %v1382_v4  ;;  %v2162_v4 = vpack.c.bf16 %v1408_v56, %v1406_v55  ;;  %v2164_v8 = vpack.c.bf16 %v1413_v63, %v1411_v62 }
 0x117   :  { %2051 = vmatpush1.bf16.msra.mxu0 %v2050_v11  ;;  %v1386_v11 = vld [vmem:[#allocation5 + $0x1040] sm:$0xff] }
 0x118   :  { %2115 = vmatpush1.bf16.msra.mxu1 %v2114_v12  ;;  %2053 = vmatprep.subr.bf16.mxu0 %v2052_v13  ;;  %v1388_v12 = vld [vmem:[#allocation5 + $0x1050] sm:$0xff]  ;;  %v1391_v13 = vld [vmem:[#allocation5 + $0x1068] sm:$0xff] }
 0x119   :  { %2117 = vmatprep.subr.bf16.mxu1 %v2116_v17  ;;  %v2142_v15 = vpack.c.bf16 %v1388_v12, %v1386_v11  ;;  %v2144_v16 = vpack.c.bf16 %v1393_v14, %v1391_v13  ;;  %v1390_v17 = vld [vmem:[#allocation5 + $0x1060] sm:$0xff]  ;;  %v1415_v11 = vld [vmem:[#allocation5 + $0x1128] sm:$0xff]  ;;  %v1417_v12 = vld [vmem:[#allocation5 + $0x1138] sm:$0xff] }
 0x11a   :  { %v2146_v22 = vpack.c.bf16 %v1392_v18, %v1390_v17  ;;  %v2168_v14 = vpack.c.bf16 %v1417_v12, %v1415_v11  ;;  %v1419_v17 = vld [vmem:[#allocation5 + $0x1148] sm:$0xff]  ;;  %v1421_v18 = vld [vmem:[#allocation5 + $0x1158] sm:$0xff] }
 0x11b   :  { %2055 = vmatpush1.bf16.msra.mxu0 %v2054_v25  ;;  %v1394_v25 = vld [vmem:[#allocation5 + $0x1080] sm:$0xff]  ;;  %v2172_v21 = vpack.c.bf16 %v1421_v18, %v1419_v17 }
 0x11c   :  { %2119 = vmatpush1.bf16.msra.mxu1 %v2118_v26  ;;  %2057 = vmatprep.subr.bf16.mxu0 %v2056_v27  ;;  %v1396_v26 = vld [vmem:[#allocation5 + $0x1090] sm:$0xff]  ;;  %v1399_v27 = vld [vmem:[#allocation5 + $0x10a8] sm:$0xff] }
 0x11d   :  { %2121 = vmatprep.subr.bf16.mxu1 %v2120_v31  ;;  %v2152_v31 = vpack.c.bf16 %v1401_v28, %v1399_v27 }
 0x11f   :  { %2059 = vmatpush1.bf16.msra.mxu0 %v2058_v36  ;;  %v369_v36 = vpop.permute.xlu1 %368 }
 0x120   :  { %2123 = vmatpush1.bf16.msra.mxu1 %v2122_v37  ;;  %2061 = vmatprep.subr.bf16.mxu0 %v2060_v38  ;;  %v2156_v37 = vpack.c.bf16 %v1405_v34, %v1403_v20  ;;  %v1402_v38 = vld [vmem:[#allocation5 + $0x10c0] sm:$0xff]  ;;  %v1428_v34 = vld [vmem:[#allocation5 + $0x1190] sm:$0xff] }
 0x121   :  { %2125 = vmatprep.subr.bf16.mxu1 %v2124_v42  ;;  %v1407_v42 = vld [vmem:[#allocation5 + $0x10e8] sm:$0xff]  ;;  %v1426_v20 = vld [vmem:[#allocation5 + $0x1180] sm:$0xff] }
 0x123   :  { %2063 = vmatpush1.bf16.msra.mxu0 %v2062_v48 }
 0x124   :  { %2127 = vmatpush1.bf16.msra.mxu1 %v2126_v49  ;;  %2065 = vmatprep.subr.bf16.mxu0 %v2064_v50  ;;  %v2158_v50 = vpack.c.bf16 %v1404_v39, %v1402_v38  ;;  %v1430_v39 = vld [vmem:[#allocation5 + $0x11a0] sm:$0xff] }
 0x125   :  { %2129 = vmatprep.subr.bf16.mxu1 %v2128_v54  ;;  %v2160_v54 = vpack.c.bf16 %v1409_v43, %v1407_v42  ;;  %v1437_v42 = vld [vmem:[#allocation5 + $0x11d8] sm:$0xff] }
 0x127   :  { %2067 = vmatpush1.bf16.msra.mxu0 %v2066_v58 }
 0x128   :  { %2131 = vmatpush1.bf16.msra.mxu1 %v2130_v59  ;;  %2133 = vmatprep.subr.bf16.mxu0 %v2132_v61  ;;  %v529_v55 = vpop.permute.xlu0 %528 }
 0x12a   :  { %1177 = vmatmul.mubr.f32.vlgmr.msra.gmra.mrb[6].mxu0 %v2361_v60 }
 0x12b   :  { %2135 = vmatpush1.bf16.msra.mxu0 %v2134_v2  ;;  %1342 = vmatmul.mubr.f32.vlgmr.msra.gmra.mrb[6].mxu1 %v2361_v60 }
 0x12c   :  { %2137 = vmatprep.subr.bf16.mxu0 %v2136_v3  ;;  %1506 = vmatprep.mubr.f32.mxu0 %v2352_v23  ;;  %v2150_v23 = vpack.c.bf16 %v1396_v26, %v1394_v25  ;;  %v1423_v25 = vld [vmem:[#allocation5 + $0x1168] sm:$0xff]  ;;  %v1425_v26 = vld [vmem:[#allocation5 + $0x1178] sm:$0xff] }
 0x12d   :  { %v2176_v28 = vpack.c.bf16 %v1425_v26, %v1423_v25 }
 0x12f   :  { %2139 = vmatpush1.bf16.msra.mxu0 %v2138_v9  ;;  %v1410_v9 = vld [vmem:[#allocation5 + $0x1100] sm:$0xff] }
 0x130   :  { %2141 = vmatprep.subr.bf16.mxu0 %v2140_v10  ;;  %v1412_v10 = vld [vmem:[#allocation5 + $0x1110] sm:$0xff] }
 0x131   :  { %v2166_v13 = vpack.c.bf16 %v1412_v10, %v1410_v9 }
 0x133   :  { %2143 = vmatpush1.bf16.msra.mxu0 %v2142_v15  ;;  %v1414_v15 = vld [vmem:[#allocation5 + $0x1120] sm:$0xff] }
 0x134   :  { %2145 = vmatprep.subr.bf16.mxu0 %v2144_v16  ;;  %v1416_v16 = vld [vmem:[#allocation5 + $0x1130] sm:$0xff] }
 0x135   :  { %v2170_v19 = vpack.c.bf16 %v1416_v16, %v1414_v15 }
 0x137   :  { %2147 = vmatpush1.bf16.msra.mxu0 %v2146_v22  ;;  %v1418_v22 = vld [vmem:[#allocation5 + $0x1140] sm:$0xff] }
 0x138   :  { %2149 = vmatprep.subr.bf16.mxu0 %v2148_v24  ;;  %v1420_v24 = vld [vmem:[#allocation5 + $0x1150] sm:$0xff] }
 0x139   :  { %v2174_v27 = vpack.c.bf16 %v1420_v24, %v1418_v22 }
 0x13b   :  { %2151 = vmatpush1.bf16.msra.mxu0 %v2150_v23  ;;  %v1424_v23 = vld [vmem:[#allocation5 + $0x1170] sm:$0xff] }
 0x13c   :  { %2153 = vmatprep.subr.bf16.mxu0 %v2152_v31  ;;  %v1429_v31 = vld [vmem:[#allocation5 + $0x1198] sm:$0xff] }
 0x13d   :  { %v189_v40 = vpop.f32.mrb[0].mxu0 }
 0x13e   :  { %v209_v44 = vrot.slane %v189_v40, %v2357_v7  ;;  %v353_v45 = vpop.f32.mrb[0].mxu1  ;;  %v191_v46 = vpop.f32.mrb[1].mxu0  ;;  %v1432_v40 = vld [vmem:[#allocation5 + $0x11b0] sm:$0xff] }
 0x13f   :  { %v374_v47 = vrot.slane %v353_v45, %v2357_v7  ;;  %v213_v48 = vrot.slane %v191_v46, %v2357_v7  ;;  %v355_v49 = vpop.f32.mrb[1].mxu1  ;;  %2155 = vmatpush1.bf16.msra.mxu0 %v2154_v35  ;;  %v1431_v35 = vld [vmem:[#allocation5 + $0x11a8] sm:$0xff]  ;;  %v2186_v43 = vpack.c.bf16 %v1432_v40, %v1430_v39  ;;  %v1434_v45 = vld [vmem:[#allocation5 + $0x11c0] sm:$0xff]  ;;  %v1436_v46 = vld [vmem:[#allocation5 + $0x11d0] sm:$0xff] }
 0x140   :  { %v214_v51 = vmul.f32 %v209_v44, %v199_v30  ;;  %v378_v52 = vrot.slane %v355_v49, %v2357_v7  ;;  %v216_v53 = vmul.f32 %v209_v44, %v204_v41  ;;  %2157 = vmatprep.subr.bf16.mxu0 %v2156_v37  ;;  %v2182_v37 = vpack.c.bf16 %v1428_v34, %v1426_v20 }
 0x141   :  { %v379_v57 = vmul.f32 %v374_v47, %v364_v29  ;;  %v215_v58 = vmul.f32 %v213_v48, %v199_v30  ;;  %v381_v59 = vmul.f32 %v374_v47, %v369_v36  ;;  %v217_v61 = vmul.f32 %v213_v48, %v204_v41  ;;  %v1427_v30 = vld [vmem:[#allocation5 + $0x1188] sm:$0xff]  ;;  %v1441_v48 = vld [vmem:[#allocation5 + $0x11f8] sm:$0xff] }
 0x142   :  { %v380_v0 = vmul.f32 %v378_v52, %v364_v29  ;;  %v382_v1 = vmul.f32 %v378_v52, %v369_v36  ;;  %v1422_v29 = vld [vmem:[#allocation5 + $0x1160] sm:$0xff]  ;;  %v2180_v33 = vpack.c.bf16 %v1429_v31, %v1427_v30  ;;  %v1433_v36 = vld [vmem:[#allocation5 + $0x11b8] sm:$0xff]  ;;  %v1435_v41 = vld [vmem:[#allocation5 + $0x11c8] sm:$0xff]  ;;  %v2190_v49 = vpack.c.bf16 %v1436_v46, %v1434_v45 }
 0x143   :  { %v2448_v2 = vadd.f32 %v379_v57, %v214_v51  ;;  %v2450_v3 = vadd.f32 %v381_v59, %v216_v53  ;;  %2159 = vmatpush1.bf16.msra.mxu0 %v2158_v50  ;;  %v2178_v32 = vpack.c.bf16 %v1424_v23, %v1422_v29  ;;  %v2184_v38 = vpack.c.bf16 %v1433_v36, %v1431_v35  ;;  %v1439_v47 = vld [vmem:[#allocation5 + $0x11e8] sm:$0xff]  ;;  %v1438_v51 = vld [vmem:[#allocation5 + $0x11e0] sm:$0xff]  ;;  %v1440_v52 = vld [vmem:[#allocation5 + $0x11f0] sm:$0xff] }
 0x144   :  { %v2452_v5 = vadd.f32 %v380_v0, %v215_v58  ;;  %v2454_v6 = vadd.f32 %v382_v1, %v217_v61  ;;  %2161 = vmatprep.subr.bf16.mxu0 %v2160_v54  ;;  %v2188_v44 = vpack.c.bf16 %v1437_v42, %v1435_v41  ;;  %v2192_v50 = vpack.c.bf16 %v1441_v48, %v1439_v47  ;;  %v534_v54 = vpop.permute.xlu1 %533  ;;  %v694_v58 = vpop.permute.xlu0 %693 }
 0x145   :  { %v2194_v53 = vpack.c.bf16 %v1440_v52, %v1438_v51 }
 0x147   :  { %2163 = vmatpush1.bf16.msra.mxu0 %v2162_v4 }
 0x148   :  { %2165 = vmatprep.subr.bf16.mxu0 %v2164_v8  ;;  %v699_v56 = vpop.permute.xlu1 %698 }
 0x14b   :  { %2167 = vmatpush1.bf16.msra.mxu0 %v2166_v13 }
 0x14c   :  { %2169 = vmatprep.subr.bf16.mxu0 %v2168_v14  ;;  %v864_v25 = vpop.permute.xlu1 %863 }
 0x14d   :  { %v859_v26 = vpop.permute.xlu0 %858 }
 0x14f   :  { %2171 = vmatpush1.bf16.msra.mxu0 %v2170_v19 }
 0x150   :  { %2173 = vmatprep.subr.bf16.mxu0 %v2172_v21 }
 0x151   :  { %v1024_v29 = vpop.permute.xlu0 %1023 }
 0x153   :  { %2175 = vmatpush1.bf16.msra.mxu0 %v2174_v27  ;;  %v1029_v27 = vpop.permute.xlu1 %1028 }
 0x154   :  { %2177 = vmatprep.subr.bf16.mxu0 %v2176_v28 }
 0x157   :  { %2179 = vmatpush1.bf16.msra.mxu0 %v2178_v32 }
 0x158   :  { %2181 = vmatprep.subr.bf16.mxu0 %v2180_v33 }
 0x15b   :  { %2183 = vmatpush1.bf16.msra.mxu0 %v2182_v37 }
 0x15c   :  { %2185 = vmatprep.subr.bf16.mxu0 %v2184_v38 }
 0x15e   :  { %v1194_v47 = vpop.permute.xlu1 %1193 }
 0x15f   :  { %2187 = vmatpush1.bf16.msra.mxu0 %v2186_v43 }
 0x160   :  { %2189 = vmatprep.subr.bf16.mxu0 %v2188_v44 }
 0x163   :  { %2191 = vmatpush1.bf16.msra.mxu0 %v2190_v49 }
 0x164   :  { %2193 = vmatprep.subr.bf16.mxu0 %v2192_v50 }
 0x167   :  { %2195 = vmatpush1.bf16.msra.mxu0 %v2194_v53 }
 0x16a   :  { %1507 = vmatmul.mubr.f32.vlgmr.msra.gmra.mrb[8].mxu0 %v2361_v60 }
 0x170   :  { %v1189_v48 = vpop.permute.xlu0 %1188 }
 0x174   :  { %v1359_v49 = vpop.permute.xlu1 %1358 }
 0x175   :  { %v1354_v51 = vpop.permute.xlu0 %1353 }
 0x17d   :  { %v518_v57 = vpop.f32.mrb[2].mxu0 }
 0x17e   :  { %v539_v59 = vrot.slane %v518_v57, %v2357_v7  ;;  %v520_v61 = vpop.f32.mrb[3].mxu0  ;;  %v683_v62 = vpop.f32.mrb[2].mxu1 }
 0x17f   :  { %v543_v63 = vrot.slane %v520_v61, %v2357_v7  ;;  %v704_v0 = vrot.slane %v683_v62, %v2357_v7  ;;  %v685_v1 = vpop.f32.mrb[3].mxu1 }
 0x180   :  { %v544_v4 = vmul.f32 %v539_v59, %v529_v55  ;;  %v546_v8 = vmul.f32 %v539_v59, %v534_v54  ;;  %v708_v9 = vrot.slane %v685_v1, %v2357_v7 }
 0x181   :  { %v545_v10 = vmul.f32 %v543_v63, %v529_v55  ;;  %v547_v60 = vmul.f32 %v543_v63, %v534_v54  ;;  %v711_v11 = vmul.f32 %v704_v0, %v699_v56  ;;  %v709_v12 = vmul.f32 %v704_v0, %v694_v58 }
 0x182   :  { %v548_v13 = vadd.f32 %v544_v4, %v2448_v2  ;;  %v550_v14 = vadd.f32 %v546_v8, %v2450_v3  ;;  %v712_v15 = vmul.f32 %v708_v9, %v699_v56  ;;  %v710_v16 = vmul.f32 %v708_v9, %v694_v58 }
 0x183   :  { %v549_v17 = vadd.f32 %v545_v10, %v2452_v5  ;;  %v551_v18 = vadd.f32 %v547_v60, %v2454_v6 }
 0x184   :  { %v715_v19 = vadd.f32 %v711_v11, %v550_v14  ;;  %v713_v21 = vadd.f32 %v709_v12, %v548_v13 }
 0x185   :  { %v716_v22 = vadd.f32 %v712_v15, %v551_v18  ;;  %v714_v24 = vadd.f32 %v710_v16, %v549_v17  ;;  %v1524_v16 = vpop.permute.xlu1 %1523  ;;  %v1519_v17 = vpop.permute.xlu0 %1518 }
 0x1bd   :  { %v848_v28 = vpop.f32.mrb[4].mxu0 }
 0x1be   :  { %v869_v23 = vrot.slane %v848_v28, %v2357_v7  ;;  %v850_v2 = vpop.f32.mrb[5].mxu0  ;;  %v1013_v30 = vpop.f32.mrb[4].mxu1 }
 0x1bf   :  { %v873_v3 = vrot.slane %v850_v2, %v2357_v7  ;;  %v1034_v31 = vrot.slane %v1013_v30, %v2357_v7  ;;  %v1015_v5 = vpop.f32.mrb[5].mxu1 }
 0x1c0   :  { %v874_v32 = vmul.f32 %v869_v23, %v859_v26  ;;  %v876_v6 = vmul.f32 %v869_v23, %v864_v25  ;;  %v1038_v33 = vrot.slane %v1015_v5, %v2357_v7 }
 0x1c1   :  { %v875_v20 = vmul.f32 %v873_v3, %v859_v26  ;;  %v877_v34 = vmul.f32 %v873_v3, %v864_v25  ;;  %v1041_v35 = vmul.f32 %v1034_v31, %v1029_v27  ;;  %v1039_v36 = vmul.f32 %v1034_v31, %v1024_v29 }
 0x1c2   :  { %v878_v37 = vadd.f32 %v874_v32, %v713_v21  ;;  %v880_v38 = vadd.f32 %v876_v6, %v715_v19  ;;  %v1042_v39 = vmul.f32 %v1038_v33, %v1029_v27  ;;  %v1040_v40 = vmul.f32 %v1038_v33, %v1024_v29 }
 0x1c3   :  { %v879_v41 = vadd.f32 %v875_v20, %v714_v24  ;;  %v881_v42 = vadd.f32 %v877_v34, %v716_v22  ;;  %v1552_v22 = vpop.permute.xlu1 %1551  ;;  %v1547_v24 = vpop.permute.xlu0 %1546 }
 0x1c4   :  { %v1045_v43 = vadd.f32 %v1041_v35, %v880_v38  ;;  %v1043_v44 = vadd.f32 %v1039_v36, %v878_v37 }
 0x1c5   :  { %v1046_v45 = vadd.f32 %v1042_v39, %v881_v42  ;;  %v1044_v46 = vadd.f32 %v1040_v40, %v879_v41 }
 0x1c7   :  { %v1568_v32 = vpop.permute.xlu1 %1567  ;;  %v1563_v6 = vpop.permute.xlu0 %1562 }
 0x1fd   :  { %v1178_v50 = vpop.f32.mrb[6].mxu0 }
 0x1fe   :  { %v1199_v52 = vrot.slane %v1178_v50, %v2357_v7  ;;  %v1180_v53 = vpop.f32.mrb[7].mxu0  ;;  %v1343_v54 = vpop.f32.mrb[6].mxu1 }
 0x1ff   :  { %v1203_v55 = vrot.slane %v1180_v53, %v2357_v7  ;;  %v1364_v56 = vrot.slane %v1343_v54, %v2357_v7  ;;  %v1345_v57 = vpop.f32.mrb[7].mxu1 }
 0x200   :  { %v1204_v58 = vmul.f32 %v1199_v52, %v1189_v48  ;;  %v1206_v59 = vmul.f32 %v1199_v52, %v1194_v47  ;;  %v1368_v61 = vrot.slane %v1345_v57, %v2357_v7 }
 0x201   :  { %v1205_v62 = vmul.f32 %v1203_v55, %v1189_v48  ;;  %v1207_v63 = vmul.f32 %v1203_v55, %v1194_v47  ;;  %v1371_v0 = vmul.f32 %v1364_v56, %v1359_v49  ;;  %v1369_v1 = vmul.f32 %v1364_v56, %v1354_v51 }
 0x202   :  { %v1208_v4 = vadd.f32 %v1204_v58, %v1043_v44  ;;  %v1210_v8 = vadd.f32 %v1206_v59, %v1045_v43  ;;  %v1372_v9 = vmul.f32 %v1368_v61, %v1359_v49  ;;  %v1370_v10 = vmul.f32 %v1368_v61, %v1354_v51 }
 0x203   :  { %v1209_v60 = vadd.f32 %v1205_v62, %v1044_v46  ;;  %v1211_v11 = vadd.f32 %v1207_v63, %v1046_v45 }
 0x204   :  { %v1375_v12 = vadd.f32 %v1371_v0, %v1210_v8  ;;  %v1373_v13 = vadd.f32 %v1369_v1, %v1208_v4 }
 0x205   :  { %v1376_v14 = vadd.f32 %v1372_v9, %v1211_v11  ;;  %v1374_v15 = vadd.f32 %v1370_v10, %v1209_v60 }
 0x23d   :  { %v1508_v18 = vpop.f32.mrb[8].mxu0 }
 0x23e   :  { %v1529_v19 = vrot.slane %v1508_v18, %v2357_v7  ;;  %v1510_v21 = vpop.f32.mrb[9].mxu0 }
 0x23f   :  { %v1533_v25 = vrot.slane %v1510_v21, %v2357_v7 }
 0x240   :  { %v1534_v26 = vmul.f32 %v1529_v19, %v1519_v17  ;;  %v1536_v27 = vmul.f32 %v1529_v19, %v1524_v16 }
 0x241   :  { %v1535_v28 = vmul.f32 %v1533_v25, %v1519_v17  ;;  %v1537_v29 = vmul.f32 %v1533_v25, %v1524_v16 }
 0x242   :  { %v1538_v23 = vadd.f32 %v1534_v26, %v1373_v13  ;;  %v1540_v2 = vadd.f32 %v1536_v27, %v1375_v12 }
 0x243   :  { %v1539_v30 = vadd.f32 %v1535_v28, %v1374_v15  ;;  %v1541_v3 = vadd.f32 %v1537_v29, %v1376_v14 }
 0x244   :  { %v1554_v31 = vmul.f32 %v1547_v24, %v1538_v23  ;;  %v1556_v5 = vmul.f32 %v1552_v22, %v1540_v2 }
 0x245   :  { %v1555_v33 = vmul.f32 %v1547_v24, %v1539_v30  ;;  %v1557_v20 = vmul.f32 %v1552_v22, %v1541_v3 }
 0x246   :  { %v1570_v34 = vadd.f32 %v1563_v6, %v1554_v31  ;;  %v1572_v35 = vadd.f32 %v1568_v32, %v1556_v5 }
 0x247   :  { %v1571_v36 = vadd.f32 %v1563_v6, %v1555_v33  ;;  %v1573_v37 = vadd.f32 %v1568_v32, %v1557_v20 }
 0x248   :  { %v1574_v38 = vmul.f32 0.1, %v1570_v34  ;;  %v1576_v7 = vmul.f32 0.1, %v1572_v35 }
 0x249   :  { %v1575_v39 = vmul.f32 0.1, %v1571_v36  ;;  %v1577_v40 = vmul.f32 0.1, %v1573_v37 }
 0x24a   :  { %v1578_v41 = vmax.f32 %v1570_v34, %v1574_v38  ;;  %v1580_v42 = vmax.f32 %v1572_v35, %v1576_v7 }
 0x24b   :  { %v1579_v43 = vmax.f32 %v1571_v36, %v1575_v39  ;;  %v1581_v44 = vmax.f32 %v1573_v37, %v1577_v40 }
 0x24c   :  { %1582 = vst [vmem:[#allocation7] sm:$0xff] %v1578_v41  ;;  %1584 = vst [vmem:[#allocation7 + $0x10] sm:$0xff] %v1580_v42 }
 0x24d   :  { %1583 = vst [vmem:[#allocation7 + $0x8] sm:$0xff] %v1579_v43  ;;  %1585 = vst [vmem:[#allocation7 + $0x18] sm:$0xff] %v1581_v44 }
 0x24e   :  { %2259 = shalt.err (!%p2256_p6)
}
 0x24f   :  { %s2260_s13 = scalar_lea.hbm %s2495_s5, 512 }
 0x250   :  { %p2261_p7 = scmp.ne.s32.totalorder %s2495_s5, %s2260_s13  ;;  %p2264_p8 = scmp.lt.u32.totalorder %s2260_s13, %s2495_s5 }
 0x252   :  { %p2266_p9 = pnand %p2264_p8, %p2261_p7 }
 0x254   :  { %2269 = shalt.err (!%p2266_p9)
}
 0x255   :  { %1597 = dma.vmem_to_hbm [thread:$0]  %s1592_s9, 512, %s2495_s5, [#allocation4], %s2278_s0, %s2278_s0, %s2279_s15  }
 0x256   :  { %2274 = dma.done.wait [#allocation4], 512  }
 0x257   :  { %2275 = vsyncadd [#allocation4], 4294966784 }
 0x258   :  { %1601 = vsyncpa [#allocation3], 1 }
 0x259   :  { %1602 = vsyncpa [#allocation6], 1 }
 0x25a   :  { %1603 = vsyncpa [#allocation4], 1 }

</bundles_post_ra>
